<compile_context>
chip_gen: v6e
topology: v6e:2x2x1
jax: 0.10.0
libtpu: 0.0.40
codegen_flags: <defaults>
</compile_context>

<pallas_src>
import jax
import jax.numpy as jnp
from jax import lax
from jax.experimental import pallas as pl
from jax.experimental.pallas import tpu as pltpu

LANES = 128


def _sigmoid(x):
    # One EUP push (tanh); avoids the VALU f32 divide of 1/(1+exp(-x)).
    return 0.5 * (jnp.tanh(0.5 * x) + 1.0)


def actor_kernel(x_ref, wih_ref, whh_ref, bl_ref,
                 w2_ref, b2_ref, w3_ref, b3_ref, w4_ref, b4_ref,
                 out_ref):
    """Whole forward pass in one kernel (everything fits in VMEM at these sizes).

    Gate packing along the 4H axis is (i, f, o, g) — permuted from PyTorch's
    (i, f, g, o) by the wrapper — so the three sigmoid gates are one contiguous
    3H slab and the tanh gate is the trailing H slab.
    """
    seq = x_ref.shape[0]
    H = whh_ref.shape[0]                     # lstm_hidden
    bf16 = jnp.bfloat16

    # ---- LSTM ----
    # Input contribution for every timestep in a single MXU matmul:
    #   xg[t] = x[t] @ W_ih^T + (b_ih + b_hh)           -> (seq, 4H) f32 value
    xg = jnp.dot(x_ref[...].astype(bf16), wih_ref[...],
                 preferred_element_type=jnp.float32) + bl_ref[...]

    h = jnp.zeros((1, H), jnp.float32)
    c = jnp.zeros((1, H), jnp.float32)
    rows = []
    for t in range(seq):                     # fully unrolled: seq is static
        gates = xg[t:t + 1, :] + jnp.dot(
            h.astype(bf16), whh_ref[...], preferred_element_type=jnp.float32)
        ifo = _sigmoid(gates[:, :3 * H])     # sigmoid over (i, f, o) in one slab
        g = jnp.tanh(gates[:, 3 * H:])
        c = ifo[:, H:2 * H] * c + ifo[:, :H] * g
        h = ifo[:, 2 * H:3 * H] * jnp.tanh(c)
        rows.append(h)
    hs = jnp.concatenate(rows, axis=0)       # (seq, H) f32, stays in vregs

    # ---- MLP head ----
    h2 = jnp.maximum(
        jnp.dot(hs.astype(bf16), w2_ref[...],
                preferred_element_type=jnp.float32) + b2_ref[...], 0.0)
    h3 = jnp.maximum(
        jnp.dot(h2.astype(bf16), w3_ref[...],
                preferred_element_type=jnp.float32) + b3_ref[...], 0.0)
    out_ref[...] = _sigmoid(
        jnp.dot(h3.astype(bf16), w4_ref[...],
                preferred_element_type=jnp.float32) + b4_ref[...])


def actor_net_forward(x, params):
    """x: (seq, state_num) float32.  Returns (1, seq, action_num), matching
    PyTorch's `x.unsqueeze(0)` batch dimension."""
    seq, state_num = x.shape
    H = params["w_hh_T"].shape[0]
    hidden2 = params["w2_T"].shape[1]
    hidden3 = params["w3_T"].shape[1]
    action_num = params["w4_T"].shape[1]

    # Lane-dense output: zero-pad fc4 to a multiple of 128 output lanes
    # (free compute on the MXU, unmasked stores); slice back below.
    out_pad = ((action_num + LANES - 1) // LANES) * LANES
    w4_pad = jnp.zeros((hidden3, out_pad), params["w4_T"].dtype
                       ).at[:, :action_num].set(params["w4_T"])
    b4_pad = jnp.zeros((1, out_pad), jnp.float32
                       ).at[:, :action_num].set(params["b4"])

    inputs = (x, params["w_ih_T"], params["w_hh_T"], params["b_lstm"],
              params["w2_T"], params["b2"], params["w3_T"], params["b3"],
              w4_pad, b4_pad)

    flops = 2 * seq * (state_num * 4 * H + H * 4 * H
                       + H * hidden2 + hidden2 * hidden3 + hidden3 * out_pad)
    transcendentals = seq * (5 * H + out_pad)   # gate activations + tanh(c) + fc4 sigmoid
    bytes_accessed = int(sum(int(a.size) * a.dtype.itemsize for a in inputs)
                         + seq * out_pad * 4)

    vmem = pl.BlockSpec(memory_space=pltpu.MemorySpace.VMEM)
    out = pl.pallas_call(
        actor_kernel,
        out_shape=jax.ShapeDtypeStruct((seq, out_pad), jnp.float32),
        in_specs=[vmem] * len(inputs),
        out_specs=vmem,
        cost_estimate=pl.CostEstimate(flops=flops,
                                      transcendentals=transcendentals,
                                      bytes_accessed=bytes_accessed),
    )(*inputs)
    return out[None, :, :action_num]


def init_params(key, state_num, action_num, hidden2=256, hidden3=256, lstm_hidden=128):
    """Deterministic synthetic parameters with the PyTorch module's shapes.

    Weight matrices are stored pre-transposed as (in_features, out_features) in
    bfloat16; the LSTM gate blocks are permuted from PyTorch's (i, f, g, o) to
    (i, f, o, g) so the kernel can fuse the three sigmoid gates."""
    ks = jax.random.split(key, 10)
    H = lstm_hidden

    def u(k, shape, fan_in):
        bound = 1.0 / jnp.sqrt(fan_in)
        return jax.random.uniform(k, shape, jnp.float32, -bound, bound)

    # PyTorch layout: weight_ih (4H, in), weight_hh (4H, H), biases (4H,),
    # gate order (i, f, g, o) along the leading 4H axis.
    w_ih = u(ks[0], (4 * H, state_num), H)
    w_hh = u(ks[1], (4 * H, H), H)
    b_ih = u(ks[2], (4 * H,), H)
    b_hh = u(ks[3], (4 * H,), H)

    def to_ifog(w):                          # (i, f, g, o) -> (i, f, o, g) on axis 0
        i, f, g, o = jnp.split(w, 4, axis=0)
        return jnp.concatenate([i, f, o, g], axis=0)

    w_ih = to_ifog(w_ih)
    w_hh = to_ifog(w_hh)
    b_lstm = to_ifog(b_ih + b_hh)

    w2 = u(ks[4], (hidden2, H), H)
    b2 = u(ks[5], (hidden2,), H)
    w3 = u(ks[6], (hidden3, hidden2), hidden2)
    b3 = u(ks[7], (hidden3,), hidden2)
    w4 = u(ks[8], (action_num, hidden3), hidden3)
    b4 = u(ks[9], (action_num,), hidden3)

    bf16 = jnp.bfloat16
    return {
        "w_ih_T": w_ih.T.astype(bf16),                 # (state_num, 4H)
        "w_hh_T": w_hh.T.astype(bf16),                 # (H, 4H)
        "b_lstm": b_lstm.reshape(1, 4 * H),            # f32 (1, 4H)
        "w2_T": w2.T.astype(bf16), "b2": b2.reshape(1, -1),
        "w3_T": w3.T.astype(bf16), "b3": b3.reshape(1, -1),
        "w4_T": w4.T.astype(bf16), "b4": b4.reshape(1, -1),
    }


def reference_forward(x, params):
    """Pure-JAX reference with the same numerics as the kernel (bf16 weights /
    bf16 matmul inputs, f32 accumulation, (i, f, o, g) gate packing)."""
    H = params["w_hh_T"].shape[0]
    bf16 = jnp.bfloat16
    xg = jnp.dot(x.astype(bf16), params["w_ih_T"],
                 preferred_element_type=jnp.float32) + params["b_lstm"]

    def step(carry, g_in):
        h, c = carry
        g = g_in[None, :] + jnp.dot(h.astype(bf16), params["w_hh_T"],
                                    preferred_element_type=jnp.float32)
        i = jax.nn.sigmoid(g[:, 0 * H:1 * H])
        f = jax.nn.sigmoid(g[:, 1 * H:2 * H])
        o = jax.nn.sigmoid(g[:, 2 * H:3 * H])
        gg = jnp.tanh(g[:, 3 * H:4 * H])
        c = f * c + i * gg
        h = o * jnp.tanh(c)
        return (h, c), h[0]

    init = (jnp.zeros((1, H), jnp.float32), jnp.zeros((1, H), jnp.float32))
    (_, _), hs = lax.scan(step, init, xg)
    h2 = jax.nn.relu(jnp.dot(hs.astype(bf16), params["w2_T"],
                             preferred_element_type=jnp.float32) + params["b2"])
    h3 = jax.nn.relu(jnp.dot(h2.astype(bf16), params["w3_T"],
                             preferred_element_type=jnp.float32) + params["b3"])
    out = jax.nn.sigmoid(jnp.dot(h3.astype(bf16), params["w4_T"],
                                 preferred_element_type=jnp.float32) + params["b4"])
    return out[None]


if __name__ == "__main__":
    # Small shapes consistent with the module: seq=8 timesteps, state_num=16 features.
    seq, state_num, action_num = 8, 16, 4
    key = jax.random.PRNGKey(0)
    kx, kp = jax.random.split(key)
    x = jax.random.normal(kx, (seq, state_num), jnp.float32)
    params = init_params(kp, state_num, action_num,
                         hidden2=256, hidden3=256, lstm_hidden=128)

    out = actor_net_forward(x, params)
    out = jax.block_until_ready(out)

    ref = reference_forward(x, params)
    assert out.shape == (1, seq, action_num), out.shape
    err = float(jnp.max(jnp.abs(out - ref)))
    # bf16-weight matmuls (f32 accumulation) + tanh-form sigmoid: tolerance is
    # slightly looser than a pure-f32 comparison.
    assert jnp.allclose(out, ref, atol=2e-3, rtol=2e-3), err

    print("KERNEL_OK")
</pallas_src>

<mosaic_0001>
module attributes {stable_mosaic.version = 11 : i64} {
  func.func @actor_kernel(%arg0: memref<8x16xf32, #tpu.memory_space<vmem>>, %arg1: memref<16x512xbf16, #tpu.memory_space<vmem>>, %arg2: memref<128x512xbf16, #tpu.memory_space<vmem>>, %arg3: memref<1x512xf32, #tpu.memory_space<vmem>>, %arg4: memref<128x256xbf16, #tpu.memory_space<vmem>>, %arg5: memref<1x256xf32, #tpu.memory_space<vmem>>, %arg6: memref<256x256xbf16, #tpu.memory_space<vmem>>, %arg7: memref<1x256xf32, #tpu.memory_space<vmem>>, %arg8: memref<256x128xbf16, #tpu.memory_space<vmem>>, %arg9: memref<1x128xf32, #tpu.memory_space<vmem>>, %arg10: memref<8x128xf32, #tpu.memory_space<vmem>>) attributes {dimension_semantics = [], scalar_prefetch = 0 : i64, scratch_operands = 0 : i64, tpu.core_type = #tpu.core_type<tc>} {
    %c0 = arith.constant 0 : index
    %c0_0 = arith.constant 0 : index
    %0 = vector.load %arg0[%c0, %c0_0] : memref<8x16xf32, #tpu.memory_space<vmem>>, vector<8x16xf32>
    %1 = arith.truncf %0 : vector<8x16xf32> to vector<8x16xbf16>
    %c0_1 = arith.constant 0 : index
    %c0_2 = arith.constant 0 : index
    %2 = vector.load %arg1[%c0_1, %c0_2] : memref<16x512xbf16, #tpu.memory_space<vmem>>, vector<16x512xbf16>
    %cst = arith.constant dense<0.000000e+00> : vector<8x512xf32>
    %3 = tpu.matmul %1, %2, %cst {dimension_numbers = #tpu.dot_dimension_numbers<[1], [0], [0], [1], [0, 0, 1, 1], [], []>} : vector<8x16xbf16>, vector<16x512xbf16>, vector<8x512xf32> -> vector<8x512xf32>
    %c0_3 = arith.constant 0 : index
    %c0_4 = arith.constant 0 : index
    %4 = vector.load %arg3[%c0_3, %c0_4] : memref<1x512xf32, #tpu.memory_space<vmem>>, vector<1x512xf32>
    %5 = vector.broadcast %4 : vector<1x512xf32> to vector<8x512xf32>
    %6 = arith.addf %3, %5 : vector<8x512xf32>
    %cst_5 = arith.constant 0.000000e+00 : f32
    %7 = vector.broadcast %cst_5 : f32 to vector<1x128xf32>
    %cst_6 = arith.constant 0.000000e+00 : f32
    %8 = vector.broadcast %cst_6 : f32 to vector<1x128xf32>
    %9 = vector.extract_strided_slice %6 {offsets = [0, 0], sizes = [1, 512], strides = [1, 1]} : vector<8x512xf32> to vector<1x512xf32>
    %10 = arith.truncf %7 : vector<1x128xf32> to vector<1x128xbf16>
    %c0_7 = arith.constant 0 : index
    %c0_8 = arith.constant 0 : index
    %11 = vector.load %arg2[%c0_7, %c0_8] : memref<128x512xbf16, #tpu.memory_space<vmem>>, vector<128x512xbf16>
    %cst_9 = arith.constant dense<0.000000e+00> : vector<1x512xf32>
    %12 = tpu.matmul %10, %11, %cst_9 {dimension_numbers = #tpu.dot_dimension_numbers<[1], [0], [0], [1], [0, 0, 1, 1], [], []>} : vector<1x128xbf16>, vector<128x512xbf16>, vector<1x512xf32> -> vector<1x512xf32>
    %13 = arith.addf %9, %12 : vector<1x512xf32>
    %14 = vector.extract_strided_slice %13 {offsets = [0, 0], sizes = [1, 384], strides = [1, 1]} : vector<1x512xf32> to vector<1x384xf32>
    %cst_10 = arith.constant 5.000000e-01 : f32
    %15 = vector.broadcast %cst_10 : f32 to vector<1x384xf32>
    %16 = arith.mulf %15, %14 : vector<1x384xf32>
    %17 = math.tanh %16 : vector<1x384xf32>
    %cst_11 = arith.constant 1.000000e+00 : f32
    %18 = vector.broadcast %cst_11 : f32 to vector<1x384xf32>
    %19 = arith.addf %17, %18 : vector<1x384xf32>
    %cst_12 = arith.constant 5.000000e-01 : f32
    %20 = vector.broadcast %cst_12 : f32 to vector<1x384xf32>
    %21 = arith.mulf %20, %19 : vector<1x384xf32>
    %22 = vector.extract_strided_slice %13 {offsets = [0, 384], sizes = [1, 128], strides = [1, 1]} : vector<1x512xf32> to vector<1x128xf32>
    %23 = math.tanh %22 : vector<1x128xf32>
    %24 = vector.extract_strided_slice %21 {offsets = [0, 128], sizes = [1, 128], strides = [1, 1]} : vector<1x384xf32> to vector<1x128xf32>
    %25 = arith.mulf %24, %8 : vector<1x128xf32>
    %26 = vector.extract_strided_slice %21 {offsets = [0, 0], sizes = [1, 128], strides = [1, 1]} : vector<1x384xf32> to vector<1x128xf32>
    %27 = arith.mulf %26, %23 : vector<1x128xf32>
    %28 = arith.addf %25, %27 : vector<1x128xf32>
    %29 = vector.extract_strided_slice %21 {offsets = [0, 256], sizes = [1, 128], strides = [1, 1]} : vector<1x384xf32> to vector<1x128xf32>
    %30 = math.tanh %28 : vector<1x128xf32>
    %31 = arith.mulf %29, %30 : vector<1x128xf32>
    %32 = vector.extract_strided_slice %6 {offsets = [1, 0], sizes = [1, 512], strides = [1, 1]} : vector<8x512xf32> to vector<1x512xf32>
    %33 = arith.truncf %31 : vector<1x128xf32> to vector<1x128xbf16>
    %c0_13 = arith.constant 0 : index
    %c0_14 = arith.constant 0 : index
    %34 = vector.load %arg2[%c0_13, %c0_14] : memref<128x512xbf16, #tpu.memory_space<vmem>>, vector<128x512xbf16>
    %cst_15 = arith.constant dense<0.000000e+00> : vector<1x512xf32>
    %35 = tpu.matmul %33, %34, %cst_15 {dimension_numbers = #tpu.dot_dimension_numbers<[1], [0], [0], [1], [0, 0, 1, 1], [], []>} : vector<1x128xbf16>, vector<128x512xbf16>, vector<1x512xf32> -> vector<1x512xf32>
    %36 = arith.addf %32, %35 : vector<1x512xf32>
    %37 = vector.extract_strided_slice %36 {offsets = [0, 0], sizes = [1, 384], strides = [1, 1]} : vector<1x512xf32> to vector<1x384xf32>
    %cst_16 = arith.constant 5.000000e-01 : f32
    %38 = vector.broadcast %cst_16 : f32 to vector<1x384xf32>
    %39 = arith.mulf %38, %37 : vector<1x384xf32>
    %40 = math.tanh %39 : vector<1x384xf32>
    %cst_17 = arith.constant 1.000000e+00 : f32
    %41 = vector.broadcast %cst_17 : f32 to vector<1x384xf32>
    %42 = arith.addf %40, %41 : vector<1x384xf32>
    %cst_18 = arith.constant 5.000000e-01 : f32
    %43 = vector.broadcast %cst_18 : f32 to vector<1x384xf32>
    %44 = arith.mulf %43, %42 : vector<1x384xf32>
    %45 = vector.extract_strided_slice %36 {offsets = [0, 384], sizes = [1, 128], strides = [1, 1]} : vector<1x512xf32> to vector<1x128xf32>
    %46 = math.tanh %45 : vector<1x128xf32>
    %47 = vector.extract_strided_slice %44 {offsets = [0, 128], sizes = [1, 128], strides = [1, 1]} : vector<1x384xf32> to vector<1x128xf32>
    %48 = arith.mulf %47, %28 : vector<1x128xf32>
    %49 = vector.extract_strided_slice %44 {offsets = [0, 0], sizes = [1, 128], strides = [1, 1]} : vector<1x384xf32> to vector<1x128xf32>
    %50 = arith.mulf %49, %46 : vector<1x128xf32>
    %51 = arith.addf %48, %50 : vector<1x128xf32>
    %52 = vector.extract_strided_slice %44 {offsets = [0, 256], sizes = [1, 128], strides = [1, 1]} : vector<1x384xf32> to vector<1x128xf32>
    %53 = math.tanh %51 : vector<1x128xf32>
    %54 = arith.mulf %52, %53 : vector<1x128xf32>
    %55 = vector.extract_strided_slice %6 {offsets = [2, 0], sizes = [1, 512], strides = [1, 1]} : vector<8x512xf32> to vector<1x512xf32>
    %56 = arith.truncf %54 : vector<1x128xf32> to vector<1x128xbf16>
    %c0_19 = arith.constant 0 : index
    %c0_20 = arith.constant 0 : index
    %57 = vector.load %arg2[%c0_19, %c0_20] : memref<128x512xbf16, #tpu.memory_space<vmem>>, vector<128x512xbf16>
    %cst_21 = arith.constant dense<0.000000e+00> : vector<1x512xf32>
    %58 = tpu.matmul %56, %57, %cst_21 {dimension_numbers = #tpu.dot_dimension_numbers<[1], [0], [0], [1], [0, 0, 1, 1], [], []>} : vector<1x128xbf16>, vector<128x512xbf16>, vector<1x512xf32> -> vector<1x512xf32>
    %59 = arith.addf %55, %58 : vector<1x512xf32>
    %60 = vector.extract_strided_slice %59 {offsets = [0, 0], sizes = [1, 384], strides = [1, 1]} : vector<1x512xf32> to vector<1x384xf32>
    %cst_22 = arith.constant 5.000000e-01 : f32
    %61 = vector.broadcast %cst_22 : f32 to vector<1x384xf32>
    %62 = arith.mulf %61, %60 : vector<1x384xf32>
    %63 = math.tanh %62 : vector<1x384xf32>
    %cst_23 = arith.constant 1.000000e+00 : f32
    %64 = vector.broadcast %cst_23 : f32 to vector<1x384xf32>
    %65 = arith.addf %63, %64 : vector<1x384xf32>
    %cst_24 = arith.constant 5.000000e-01 : f32
    %66 = vector.broadcast %cst_24 : f32 to vector<1x384xf32>
    %67 = arith.mulf %66, %65 : vector<1x384xf32>
    %68 = vector.extract_strided_slice %59 {offsets = [0, 384], sizes = [1, 128], strides = [1, 1]} : vector<1x512xf32> to vector<1x128xf32>
    %69 = math.tanh %68 : vector<1x128xf32>
    %70 = vector.extract_strided_slice %67 {offsets = [0, 128], sizes = [1, 128], strides = [1, 1]} : vector<1x384xf32> to vector<1x128xf32>
    %71 = arith.mulf %70, %51 : vector<1x128xf32>
    %72 = vector.extract_strided_slice %67 {offsets = [0, 0], sizes = [1, 128], strides = [1, 1]} : vector<1x384xf32> to vector<1x128xf32>
    %73 = arith.mulf %72, %69 : vector<1x128xf32>
    %74 = arith.addf %71, %73 : vector<1x128xf32>
    %75 = vector.extract_strided_slice %67 {offsets = [0, 256], sizes = [1, 128], strides = [1, 1]} : vector<1x384xf32> to vector<1x128xf32>
    %76 = math.tanh %74 : vector<1x128xf32>
    %77 = arith.mulf %75, %76 : vector<1x128xf32>
    %78 = vector.extract_strided_slice %6 {offsets = [3, 0], sizes = [1, 512], strides = [1, 1]} : vector<8x512xf32> to vector<1x512xf32>
    %79 = arith.truncf %77 : vector<1x128xf32> to vector<1x128xbf16>
    %c0_25 = arith.constant 0 : index
    %c0_26 = arith.constant 0 : index
    %80 = vector.load %arg2[%c0_25, %c0_26] : memref<128x512xbf16, #tpu.memory_space<vmem>>, vector<128x512xbf16>
    %cst_27 = arith.constant dense<0.000000e+00> : vector<1x512xf32>
    %81 = tpu.matmul %79, %80, %cst_27 {dimension_numbers = #tpu.dot_dimension_numbers<[1], [0], [0], [1], [0, 0, 1, 1], [], []>} : vector<1x128xbf16>, vector<128x512xbf16>, vector<1x512xf32> -> vector<1x512xf32>
    %82 = arith.addf %78, %81 : vector<1x512xf32>
    %83 = vector.extract_strided_slice %82 {offsets = [0, 0], sizes = [1, 384], strides = [1, 1]} : vector<1x512xf32> to vector<1x384xf32>
    %cst_28 = arith.constant 5.000000e-01 : f32
    %84 = vector.broadcast %cst_28 : f32 to vector<1x384xf32>
    %85 = arith.mulf %84, %83 : vector<1x384xf32>
    %86 = math.tanh %85 : vector<1x384xf32>
    %cst_29 = arith.constant 1.000000e+00 : f32
    %87 = vector.broadcast %cst_29 : f32 to vector<1x384xf32>
    %88 = arith.addf %86, %87 : vector<1x384xf32>
    %cst_30 = arith.constant 5.000000e-01 : f32
    %89 = vector.broadcast %cst_30 : f32 to vector<1x384xf32>
    %90 = arith.mulf %89, %88 : vector<1x384xf32>
    %91 = vector.extract_strided_slice %82 {offsets = [0, 384], sizes = [1, 128], strides = [1, 1]} : vector<1x512xf32> to vector<1x128xf32>
    %92 = math.tanh %91 : vector<1x128xf32>
    %93 = vector.extract_strided_slice %90 {offsets = [0, 128], sizes = [1, 128], strides = [1, 1]} : vector<1x384xf32> to vector<1x128xf32>
    %94 = arith.mulf %93, %74 : vector<1x128xf32>
    %95 = vector.extract_strided_slice %90 {offsets = [0, 0], sizes = [1, 128], strides = [1, 1]} : vector<1x384xf32> to vector<1x128xf32>
    %96 = arith.mulf %95, %92 : vector<1x128xf32>
    %97 = arith.addf %94, %96 : vector<1x128xf32>
    %98 = vector.extract_strided_slice %90 {offsets = [0, 256], sizes = [1, 128], strides = [1, 1]} : vector<1x384xf32> to vector<1x128xf32>
    %99 = math.tanh %97 : vector<1x128xf32>
    %100 = arith.mulf %98, %99 : vector<1x128xf32>
    %101 = vector.extract_strided_slice %6 {offsets = [4, 0], sizes = [1, 512], strides = [1, 1]} : vector<8x512xf32> to vector<1x512xf32>
    %102 = arith.truncf %100 : vector<1x128xf32> to vector<1x128xbf16>
    %c0_31 = arith.constant 0 : index
    %c0_32 = arith.constant 0 : index
    %103 = vector.load %arg2[%c0_31, %c0_32] : memref<128x512xbf16, #tpu.memory_space<vmem>>, vector<128x512xbf16>
    %cst_33 = arith.constant dense<0.000000e+00> : vector<1x512xf32>
    %104 = tpu.matmul %102, %103, %cst_33 {dimension_numbers = #tpu.dot_dimension_numbers<[1], [0], [0], [1], [0, 0, 1, 1], [], []>} : vector<1x128xbf16>, vector<128x512xbf16>, vector<1x512xf32> -> vector<1x512xf32>
    %105 = arith.addf %101, %104 : vector<1x512xf32>
    %106 = vector.extract_strided_slice %105 {offsets = [0, 0], sizes = [1, 384], strides = [1, 1]} : vector<1x512xf32> to vector<1x384xf32>
    %cst_34 = arith.constant 5.000000e-01 : f32
    %107 = vector.broadcast %cst_34 : f32 to vector<1x384xf32>
    %108 = arith.mulf %107, %106 : vector<1x384xf32>
    %109 = math.tanh %108 : vector<1x384xf32>
    %cst_35 = arith.constant 1.000000e+00 : f32
    %110 = vector.broadcast %cst_35 : f32 to vector<1x384xf32>
    %111 = arith.addf %109, %110 : vector<1x384xf32>
    %cst_36 = arith.constant 5.000000e-01 : f32
    %112 = vector.broadcast %cst_36 : f32 to vector<1x384xf32>
    %113 = arith.mulf %112, %111 : vector<1x384xf32>
    %114 = vector.extract_strided_slice %105 {offsets = [0, 384], sizes = [1, 128], strides = [1, 1]} : vector<1x512xf32> to vector<1x128xf32>
    %115 = math.tanh %114 : vector<1x128xf32>
    %116 = vector.extract_strided_slice %113 {offsets = [0, 128], sizes = [1, 128], strides = [1, 1]} : vector<1x384xf32> to vector<1x128xf32>
    %117 = arith.mulf %116, %97 : vector<1x128xf32>
    %118 = vector.extract_strided_slice %113 {offsets = [0, 0], sizes = [1, 128], strides = [1, 1]} : vector<1x384xf32> to vector<1x128xf32>
    %119 = arith.mulf %118, %115 : vector<1x128xf32>
    %120 = arith.addf %117, %119 : vector<1x128xf32>
    %121 = vector.extract_strided_slice %113 {offsets = [0, 256], sizes = [1, 128], strides = [1, 1]} : vector<1x384xf32> to vector<1x128xf32>
    %122 = math.tanh %120 : vector<1x128xf32>
    %123 = arith.mulf %121, %122 : vector<1x128xf32>
    %124 = vector.extract_strided_slice %6 {offsets = [5, 0], sizes = [1, 512], strides = [1, 1]} : vector<8x512xf32> to vector<1x512xf32>
    %125 = arith.truncf %123 : vector<1x128xf32> to vector<1x128xbf16>
    %c0_37 = arith.constant 0 : index
    %c0_38 = arith.constant 0 : index
    %126 = vector.load %arg2[%c0_37, %c0_38] : memref<128x512xbf16, #tpu.memory_space<vmem>>, vector<128x512xbf16>
    %cst_39 = arith.constant dense<0.000000e+00> : vector<1x512xf32>
    %127 = tpu.matmul %125, %126, %cst_39 {dimension_numbers = #tpu.dot_dimension_numbers<[1], [0], [0], [1], [0, 0, 1, 1], [], []>} : vector<1x128xbf16>, vector<128x512xbf16>, vector<1x512xf32> -> vector<1x512xf32>
    %128 = arith.addf %124, %127 : vector<1x512xf32>
    %129 = vector.extract_strided_slice %128 {offsets = [0, 0], sizes = [1, 384], strides = [1, 1]} : vector<1x512xf32> to vector<1x384xf32>
    %cst_40 = arith.constant 5.000000e-01 : f32
    %130 = vector.broadcast %cst_40 : f32 to vector<1x384xf32>
    %131 = arith.mulf %130, %129 : vector<1x384xf32>
    %132 = math.tanh %131 : vector<1x384xf32>
    %cst_41 = arith.constant 1.000000e+00 : f32
    %133 = vector.broadcast %cst_41 : f32 to vector<1x384xf32>
    %134 = arith.addf %132, %133 : vector<1x384xf32>
    %cst_42 = arith.constant 5.000000e-01 : f32
    %135 = vector.broadcast %cst_42 : f32 to vector<1x384xf32>
    %136 = arith.mulf %135, %134 : vector<1x384xf32>
    %137 = vector.extract_strided_slice %128 {offsets = [0, 384], sizes = [1, 128], strides = [1, 1]} : vector<1x512xf32> to vector<1x128xf32>
    %138 = math.tanh %137 : vector<1x128xf32>
    %139 = vector.extract_strided_slice %136 {offsets = [0, 128], sizes = [1, 128], strides = [1, 1]} : vector<1x384xf32> to vector<1x128xf32>
    %140 = arith.mulf %139, %120 : vector<1x128xf32>
    %141 = vector.extract_strided_slice %136 {offsets = [0, 0], sizes = [1, 128], strides = [1, 1]} : vector<1x384xf32> to vector<1x128xf32>
    %142 = arith.mulf %141, %138 : vector<1x128xf32>
    %143 = arith.addf %140, %142 : vector<1x128xf32>
    %144 = vector.extract_strided_slice %136 {offsets = [0, 256], sizes = [1, 128], strides = [1, 1]} : vector<1x384xf32> to vector<1x128xf32>
    %145 = math.tanh %143 : vector<1x128xf32>
    %146 = arith.mulf %144, %145 : vector<1x128xf32>
    %147 = vector.extract_strided_slice %6 {offsets = [6, 0], sizes = [1, 512], strides = [1, 1]} : vector<8x512xf32> to vector<1x512xf32>
    %148 = arith.truncf %146 : vector<1x128xf32> to vector<1x128xbf16>
    %c0_43 = arith.constant 0 : index
    %c0_44 = arith.constant 0 : index
    %149 = vector.load %arg2[%c0_43, %c0_44] : memref<128x512xbf16, #tpu.memory_space<vmem>>, vector<128x512xbf16>
    %cst_45 = arith.constant dense<0.000000e+00> : vector<1x512xf32>
    %150 = tpu.matmul %148, %149, %cst_45 {dimension_numbers = #tpu.dot_dimension_numbers<[1], [0], [0], [1], [0, 0, 1, 1], [], []>} : vector<1x128xbf16>, vector<128x512xbf16>, vector<1x512xf32> -> vector<1x512xf32>
    %151 = arith.addf %147, %150 : vector<1x512xf32>
    %152 = vector.extract_strided_slice %151 {offsets = [0, 0], sizes = [1, 384], strides = [1, 1]} : vector<1x512xf32> to vector<1x384xf32>
    %cst_46 = arith.constant 5.000000e-01 : f32
    %153 = vector.broadcast %cst_46 : f32 to vector<1x384xf32>
    %154 = arith.mulf %153, %152 : vector<1x384xf32>
    %155 = math.tanh %154 : vector<1x384xf32>
    %cst_47 = arith.constant 1.000000e+00 : f32
    %156 = vector.broadcast %cst_47 : f32 to vector<1x384xf32>
    %157 = arith.addf %155, %156 : vector<1x384xf32>
    %cst_48 = arith.constant 5.000000e-01 : f32
    %158 = vector.broadcast %cst_48 : f32 to vector<1x384xf32>
    %159 = arith.mulf %158, %157 : vector<1x384xf32>
    %160 = vector.extract_strided_slice %151 {offsets = [0, 384], sizes = [1, 128], strides = [1, 1]} : vector<1x512xf32> to vector<1x128xf32>
    %161 = math.tanh %160 : vector<1x128xf32>
    %162 = vector.extract_strided_slice %159 {offsets = [0, 128], sizes = [1, 128], strides = [1, 1]} : vector<1x384xf32> to vector<1x128xf32>
    %163 = arith.mulf %162, %143 : vector<1x128xf32>
    %164 = vector.extract_strided_slice %159 {offsets = [0, 0], sizes = [1, 128], strides = [1, 1]} : vector<1x384xf32> to vector<1x128xf32>
    %165 = arith.mulf %164, %161 : vector<1x128xf32>
    %166 = arith.addf %163, %165 : vector<1x128xf32>
    %167 = vector.extract_strided_slice %159 {offsets = [0, 256], sizes = [1, 128], strides = [1, 1]} : vector<1x384xf32> to vector<1x128xf32>
    %168 = math.tanh %166 : vector<1x128xf32>
    %169 = arith.mulf %167, %168 : vector<1x128xf32>
    %170 = vector.extract_strided_slice %6 {offsets = [7, 0], sizes = [1, 512], strides = [1, 1]} : vector<8x512xf32> to vector<1x512xf32>
    %171 = arith.truncf %169 : vector<1x128xf32> to vector<1x128xbf16>
    %c0_49 = arith.constant 0 : index
    %c0_50 = arith.constant 0 : index
    %172 = vector.load %arg2[%c0_49, %c0_50] : memref<128x512xbf16, #tpu.memory_space<vmem>>, vector<128x512xbf16>
    %cst_51 = arith.constant dense<0.000000e+00> : vector<1x512xf32>
    %173 = tpu.matmul %171, %172, %cst_51 {dimension_numbers = #tpu.dot_dimension_numbers<[1], [0], [0], [1], [0, 0, 1, 1], [], []>} : vector<1x128xbf16>, vector<128x512xbf16>, vector<1x512xf32> -> vector<1x512xf32>
    %174 = arith.addf %170, %173 : vector<1x512xf32>
    %175 = vector.extract_strided_slice %174 {offsets = [0, 0], sizes = [1, 384], strides = [1, 1]} : vector<1x512xf32> to vector<1x384xf32>
    %cst_52 = arith.constant 5.000000e-01 : f32
    %176 = vector.broadcast %cst_52 : f32 to vector<1x384xf32>
    %177 = arith.mulf %176, %175 : vector<1x384xf32>
    %178 = math.tanh %177 : vector<1x384xf32>
    %cst_53 = arith.constant 1.000000e+00 : f32
    %179 = vector.broadcast %cst_53 : f32 to vector<1x384xf32>
    %180 = arith.addf %178, %179 : vector<1x384xf32>
    %cst_54 = arith.constant 5.000000e-01 : f32
    %181 = vector.broadcast %cst_54 : f32 to vector<1x384xf32>
    %182 = arith.mulf %181, %180 : vector<1x384xf32>
    %183 = vector.extract_strided_slice %174 {offsets = [0, 384], sizes = [1, 128], strides = [1, 1]} : vector<1x512xf32> to vector<1x128xf32>
    %184 = math.tanh %183 : vector<1x128xf32>
    %185 = vector.extract_strided_slice %182 {offsets = [0, 128], sizes = [1, 128], strides = [1, 1]} : vector<1x384xf32> to vector<1x128xf32>
    %186 = arith.mulf %185, %166 : vector<1x128xf32>
    %187 = vector.extract_strided_slice %182 {offsets = [0, 0], sizes = [1, 128], strides = [1, 1]} : vector<1x384xf32> to vector<1x128xf32>
    %188 = arith.mulf %187, %184 : vector<1x128xf32>
    %189 = arith.addf %186, %188 : vector<1x128xf32>
    %190 = vector.extract_strided_slice %182 {offsets = [0, 256], sizes = [1, 128], strides = [1, 1]} : vector<1x384xf32> to vector<1x128xf32>
    %191 = math.tanh %189 : vector<1x128xf32>
    %192 = arith.mulf %190, %191 : vector<1x128xf32>
    %193 = tpu.concatenate %31, %54, %77, %100, %123, %146, %169, %192 in 0 : vector<1x128xf32>, vector<1x128xf32>, vector<1x128xf32>, vector<1x128xf32>, vector<1x128xf32>, vector<1x128xf32>, vector<1x128xf32>, vector<1x128xf32> -> vector<8x128xf32>
    %194 = arith.truncf %193 : vector<8x128xf32> to vector<8x128xbf16>
    %c0_55 = arith.constant 0 : index
    %c0_56 = arith.constant 0 : index
    %195 = vector.load %arg4[%c0_55, %c0_56] : memref<128x256xbf16, #tpu.memory_space<vmem>>, vector<128x256xbf16>
    %cst_57 = arith.constant dense<0.000000e+00> : vector<8x256xf32>
    %196 = tpu.matmul %194, %195, %cst_57 {dimension_numbers = #tpu.dot_dimension_numbers<[1], [0], [0], [1], [0, 0, 1, 1], [], []>} : vector<8x128xbf16>, vector<128x256xbf16>, vector<8x256xf32> -> vector<8x256xf32>
    %c0_58 = arith.constant 0 : index
    %c0_59 = arith.constant 0 : index
    %197 = vector.load %arg5[%c0_58, %c0_59] : memref<1x256xf32, #tpu.memory_space<vmem>>, vector<1x256xf32>
    %198 = vector.broadcast %197 : vector<1x256xf32> to vector<8x256xf32>
    %199 = arith.addf %196, %198 : vector<8x256xf32>
    %cst_60 = arith.constant 0.000000e+00 : f32
    %200 = vector.broadcast %cst_60 : f32 to vector<8x256xf32>
    %201 = arith.maximumf %199, %200 : vector<8x256xf32>
    %202 = arith.truncf %201 : vector<8x256xf32> to vector<8x256xbf16>
    %c0_61 = arith.constant 0 : index
    %c0_62 = arith.constant 0 : index
    %203 = vector.load %arg6[%c0_61, %c0_62] : memref<256x256xbf16, #tpu.memory_space<vmem>>, vector<256x256xbf16>
    %cst_63 = arith.constant dense<0.000000e+00> : vector<8x256xf32>
    %204 = tpu.matmul %202, %203, %cst_63 {dimension_numbers = #tpu.dot_dimension_numbers<[1], [0], [0], [1], [0, 0, 1, 1], [], []>} : vector<8x256xbf16>, vector<256x256xbf16>, vector<8x256xf32> -> vector<8x256xf32>
    %c0_64 = arith.constant 0 : index
    %c0_65 = arith.constant 0 : index
    %205 = vector.load %arg7[%c0_64, %c0_65] : memref<1x256xf32, #tpu.memory_space<vmem>>, vector<1x256xf32>
    %206 = vector.broadcast %205 : vector<1x256xf32> to vector<8x256xf32>
    %207 = arith.addf %204, %206 : vector<8x256xf32>
    %cst_66 = arith.constant 0.000000e+00 : f32
    %208 = vector.broadcast %cst_66 : f32 to vector<8x256xf32>
    %209 = arith.maximumf %207, %208 : vector<8x256xf32>
    %210 = arith.truncf %209 : vector<8x256xf32> to vector<8x256xbf16>
    %c0_67 = arith.constant 0 : index
    %c0_68 = arith.constant 0 : index
    %211 = vector.load %arg8[%c0_67, %c0_68] : memref<256x128xbf16, #tpu.memory_space<vmem>>, vector<256x128xbf16>
    %cst_69 = arith.constant dense<0.000000e+00> : vector<8x128xf32>
    %212 = tpu.matmul %210, %211, %cst_69 {dimension_numbers = #tpu.dot_dimension_numbers<[1], [0], [0], [1], [0, 0, 1, 1], [], []>} : vector<8x256xbf16>, vector<256x128xbf16>, vector<8x128xf32> -> vector<8x128xf32>
    %c0_70 = arith.constant 0 : index
    %c0_71 = arith.constant 0 : index
    %213 = vector.load %arg9[%c0_70, %c0_71] : memref<1x128xf32, #tpu.memory_space<vmem>>, vector<1x128xf32>
    %214 = vector.broadcast %213 : vector<1x128xf32> to vector<8x128xf32>
    %215 = arith.addf %212, %214 : vector<8x128xf32>
    %cst_72 = arith.constant 5.000000e-01 : f32
    %216 = vector.broadcast %cst_72 : f32 to vector<8x128xf32>
    %217 = arith.mulf %216, %215 : vector<8x128xf32>
    %218 = math.tanh %217 : vector<8x128xf32>
    %cst_73 = arith.constant 1.000000e+00 : f32
    %219 = vector.broadcast %cst_73 : f32 to vector<8x128xf32>
    %220 = arith.addf %218, %219 : vector<8x128xf32>
    %cst_74 = arith.constant 5.000000e-01 : f32
    %221 = vector.broadcast %cst_74 : f32 to vector<8x128xf32>
    %222 = arith.mulf %221, %220 : vector<8x128xf32>
    %c0_75 = arith.constant 0 : index
    %c0_76 = arith.constant 0 : index
    %223 = vector.load %arg10[%c0_75, %c0_76] : memref<8x128xf32, #tpu.memory_space<vmem>>, vector<8x128xf32>
    tpu.vector_store %arg10[%c0_75, %c0_76], %222 {strides = array<i32>} : memref<8x128xf32, #tpu.memory_space<vmem>>, vector<8x128xf32>,
    return
  }
}

</mosaic_0001>

<bundles_post_ra>
// kernel: tpu_custom_call.1
= control target key start
LH: loop header
LB: loop body
LE: loop exit
PB: predicated region body
PF: predicated region fallthrough
CT: control target
= control target key end

     0   :  { %15 = vsyncpa [#allocation3], 0  ;;  %s3192_s0 = inlined_call_operand.hbm [shape: f32[8,16], index: 0, kind: input, shape index: {}]   ;;  %s3193_s1 = inlined_call_operand.hbm [shape: bf16[16,512], index: 1, kind: input, shape index: {}]   ;;  %s3194_s2 = inlined_call_operand.hbm [shape: bf16[128,512], index: 2, kind: input, shape index: {}]   ;;  %s3195_s3 = inlined_call_operand.vmem [shape: f32[1,512], index: 3, kind: input, shape index: {}]   ;;  %s3196_s4 = inlined_call_operand.hbm [shape: bf16[128,256], index: 4, kind: input, shape index: {}]   ;;  %s3197_s5 = inlined_call_operand.vmem [shape: f32[1,256], index: 5, kind: input, shape index: {}]   ;;  %s3198_s6 = inlined_call_operand.hbm [shape: bf16[256,256], index: 6, kind: input, shape index: {}]   ;;  %s3199_s7 = inlined_call_operand.vmem [shape: f32[1,256], index: 7, kind: input, shape index: {}]   ;;  %s3200_s8 = inlined_call_operand.hbm [shape: bf16[256,128], index: 8, kind: input, shape index: {}]   ;;  %s3201_s9 = inlined_call_operand.vmem [shape: f32[1,128], index: 9, kind: input, shape index: {}]   ;;  %s3202_s10 = inlined_call_operand.hbm [shape: f32[8,128], index: 10, kind: output, shape index: {}]  }
   0x1   :  { %16 = vsyncpa [#allocation6], 0 }
   0x2   :  { %17 = vsyncpa [#allocation9], 0 }
   0x3   :  { %18 = vsyncpa [#allocation12], 0 }
   0x4   :  { %19 = vsyncpa [#allocation4], 0  ;;  %s2570_s13 = smov [#allocation5]  }
   0x5   :  { %s35_s14 = sshll.u32 %s2570_s13, 4  ;;  %s36_s14 = int_to_ptr.vmem [resolvable:$true] %s35_s14 }
   0x6   :  { %s2428_s15 = scalar_lea.vmem %s36_s14, 512  ;;  %p2433_p1 = scmp.lt.s32.totalorder %s36_s14, %s36_s14 }
   0x7   :  { %p2429_p0 = scmp.ne.s32.totalorder %s36_s14, %s2428_s15  ;;  %p2434_p2 = scmp.lt.s32.totalorder %s2428_s15, %s2428_s15 }
   0x9   :  { %p2435_p3 = por %p2434_p2, %p2433_p1 }
   0xb   :  { %p2436_p4 = pnand %p2435_p3, %p2429_p0 }
   0xd   :  { %2439 = shalt.err (!%p2436_p4)
}
   0xe   :  { %s2571_s16 = smov 256   ;;  %s2572_s17 = smov 16  }
   0xf   :  { %41 = dma.hbm_to_vmem [thread:$0]  %s3193_s1, 512, %s36_s14, [#allocation6], %s2571_s16, %s2571_s16, %s2572_s17  }
  0x10   :  { %s2573_s20 = smov [#allocation8]  }
  0x11   :  { %s61_s21 = sshll.u32 %s2573_s20, 4  ;;  %s62_s21 = int_to_ptr.vmem [resolvable:$true] %s61_s21 }
  0x12   :  { %s2448_s22 = scalar_lea.vmem %s62_s21, 2048  ;;  %p2453_p6 = scmp.lt.s32.totalorder %s62_s21, %s62_s21 }
  0x13   :  { %p2449_p5 = scmp.ne.s32.totalorder %s62_s21, %s2448_s22  ;;  %p2454_p7 = scmp.lt.s32.totalorder %s2448_s22, %s2448_s22 }
  0x15   :  { %p2455_p8 = por %p2454_p7, %p2453_p6 }
  0x17   :  { %p2456_p9 = pnand %p2455_p8, %p2449_p5 }
  0x19   :  { %2459 = shalt.err (!%p2456_p9)
}
  0x1a   :  { %s2574_s23 = smov 128   ;;  %s2575_s24 = smov 8  }
  0x1b   :  { %67 = dma.hbm_to_vmem [thread:$0]  %s3196_s4, 2048, %s62_s21, [#allocation9], %s2574_s23, %s2574_s23, %s2575_s24  }
  0x1c   :  { %s2576_s1 = smov [#allocation2]   ;;  %s2577_s28 = smov [#allocation7]  }
  0x1d   :  { %s26_s27 = sshll.u32 %s2576_s1, 4  ;;  %s47_s29 = sshll.u32 %s2577_s28, 4  ;;  %s27_s27 = int_to_ptr.vmem [resolvable:$true] %s26_s27  ;;  %s48_s29 = int_to_ptr.vmem [resolvable:$true] %s47_s29 }
  0x1e   :  { %s2468_s30 = scalar_lea.vmem %s27_s27, 128  ;;  %p2473_p11 = scmp.lt.s32.totalorder %s27_s27, %s27_s27 }
  0x1f   :  { %p2469_p10 = scmp.ne.s32.totalorder %s27_s27, %s2468_s30  ;;  %p2474_p12 = scmp.lt.s32.totalorder %s2468_s30, %s2468_s30 }
  0x21   :  { %p2475_p13 = por %p2474_p12, %p2473_p11 }
  0x23   :  { %p2476_p0 = pnand %p2475_p13, %p2469_p10 }
  0x25   :  { %2479 = shalt.err (!%p2476_p0)
}
  0x26   :  { %29 = dma.hbm_to_vmem [thread:$0]  %s3192_s0, 128, %s27_s27, [#allocation3]  }
  0x27   :  { %s2488_s13 = scalar_lea.vmem %s48_s29, 4096  ;;  %p2493_p2 = scmp.lt.s32.totalorder %s48_s29, %s48_s29 }
  0x28   :  { %p2489_p1 = scmp.ne.s32.totalorder %s48_s29, %s2488_s13  ;;  %p2494_p3 = scmp.lt.s32.totalorder %s2488_s13, %s2488_s13 }
  0x2a   :  { %p2495_p4 = por %p2494_p3, %p2493_p2 }
  0x2c   :  { %p2496_p5 = pnand %p2495_p4, %p2489_p1 }
  0x2e   :  { %2499 = shalt.err (!%p2496_p5)
}
  0x2f   :  { %53 = dma.hbm_to_vmem [thread:$0]  %s3194_s2, 4096, %s48_s29, [#allocation6], %s2571_s16, %s2571_s16, %s2572_s17  }
  0x30   :  { %s2578_s15 = smov [#allocation10]   ;;  %s2579_s19 = smov [#allocation11]  }
  0x31   :  { %s75_s18 = sshll.u32 %s2578_s15, 4  ;;  %s89_s20 = sshll.u32 %s2579_s19, 4  ;;  %s76_s18 = int_to_ptr.vmem [resolvable:$true] %s75_s18  ;;  %s90_s20 = int_to_ptr.vmem [resolvable:$true] %s89_s20 }
  0x32   :  { %s2508_s0 = scalar_lea.vmem %s76_s18, 4096  ;;  %p2513_p7 = scmp.lt.s32.totalorder %s76_s18, %s76_s18 }
  0x33   :  { %p2509_p6 = scmp.ne.s32.totalorder %s76_s18, %s2508_s0  ;;  %p2514_p8 = scmp.lt.s32.totalorder %s2508_s0, %s2508_s0 }
  0x35   :  { %p2515_p9 = por %p2514_p8, %p2513_p7 }
  0x37   :  { %p2516_p10 = pnand %p2515_p9, %p2509_p6 }
  0x39   :  { %2519 = shalt.err (!%p2516_p10)
}
  0x3a   :  { %81 = dma.hbm_to_vmem [thread:$0]  %s3198_s6, 4096, %s76_s18, [#allocation9], %s2574_s23, %s2574_s23, %s2575_s24  }
  0x3b   :  { %s2528_s2 = scalar_lea.vmem %s90_s20, 2048  ;;  %p2533_p12 = scmp.lt.s32.totalorder %s90_s20, %s90_s20 }
  0x3c   :  { %p2529_p11 = scmp.ne.s32.totalorder %s90_s20, %s2528_s2  ;;  %p2534_p13 = scmp.lt.s32.totalorder %s2528_s2, %s2528_s2 }
  0x3e   :  { %p2535_p0 = por %p2534_p13, %p2533_p12 }
  0x40   :  { %p2536_p1 = pnand %p2535_p0, %p2529_p11 }
  0x42   :  { %2539 = shalt.err (!%p2536_p1)
}
  0x43   :  { %s2580_s16 = smov 64   ;;  %s2581_s17 = smov 4  }
  0x44   :  { %95 = dma.hbm_to_vmem [thread:$0]  %s3200_s8, 2048, %s90_s20, [#allocation12], %s2580_s16, %s2580_s16, %s2581_s17  }
  0x45   :  { %2560 = dma.done.wait [#allocation3], 128  }
  0x46   :  { %2561 = vsyncadd [#allocation3], 4294967168 }
  0x47   :  { %2562 = dma.done.wait [#allocation6], 4608  }
  0x48   :  { %2563 = vsyncadd [#allocation6], 4294962688 }
  0x49   :  { %2564 = dma.done.wait [#allocation9], 6144  }
  0x4a   :  { %2565 = vsyncadd [#allocation9], 4294961152 }
  0x4b   :  { %2566 = dma.done.wait [#allocation12], 2048  }
  0x4c   :  { %2567 = vsyncadd [#allocation12], 4294965248  ;;  %v2582_v0 = vmov 0   ;;  %v2164_v1 = vld [vmem:[#allocation5 + $0x4] ss:$16 sps:$4 sm:$0xff]   ;;  %v117_v5 = vld [vmem:[#allocation2] sm:$0xff]  ;;  %v125_v47 = vlaneseq }
  0x4d   :  { %201 = vmatprep.mubr.bf16.mxu0 %v2582_v0  ;;  %242 = vmatprep.mubr.bf16.mxu1 %v2582_v0  ;;  %v2166_v2 = vld [vmem:[#allocation5 + $0xc] ss:$16 sps:$4 sm:$0xff]   ;;  %v2168_v3 = vld [vmem:[#allocation5] ss:$16 sps:$4 sm:$0xff]   ;;  %v2169_v4 = vld [vmem:[#allocation5 + $0x8] ss:$16 sps:$4 sm:$0xff]   ;;  %v118_v6 = vpack.c.bf16 %v117_v5, %v117_v5 }
  0x4e   :  { %183 = vmatprep.subr.bf16.mxu0 %v2164_v1  ;;  %224 = vmatprep.subr.bf16.mxu1 %v2166_v2  ;;  %v2671_v7 = vld [vmem:[#allocation7 + $0xe4] ss:$16 sps:$4 sm:$0xff]   ;;  %vm165_vm0 = vcmask 130048   ;;  %v2673_v8 = vld [vmem:[#allocation7 + $0xec] ss:$16 sps:$4 sm:$0xff]   ;;  %v126_v48 = vshrl.u32 %v125_v47, 7 }
  0x4f   :  { %184 = vmatpush1.bf16.msra.mxu0 %v2168_v3  ;;  %225 = vmatpush1.bf16.msra.mxu1 %v2169_v4  ;;  %v2676_v9 = vld [vmem:[#allocation7 + $0xe0] ss:$16 sps:$4 sm:$0xff]   ;;  %v2678_v10 = vld [vmem:[#allocation7 + $0xe8] ss:$16 sps:$4 sm:$0xff]   ;;  %v2681_v11 = vld [vmem:[#allocation7 + $0xc4] ss:$16 sps:$4 sm:$0xff]  }
  0x50   :  { %443 = vmatprep.subr.bf16.mxu0 %v2671_v7  ;;  %484 = vmatprep.subr.bf16.mxu1 %v2673_v8  ;;  %v2683_v12 = vld [vmem:[#allocation7 + $0xcc] ss:$16 sps:$4 sm:$0xff]   ;;  %v2685_v13 = vld [vmem:[#allocation7 + $0xc0] ss:$16 sps:$4 sm:$0xff]   ;;  %v2689_v14 = vld [vmem:[#allocation7 + $0xc8] ss:$16 sps:$4 sm:$0xff]  }
  0x51   :  { %v2693_v15 = vld [vmem:[#allocation7 + $0xa4] ss:$16 sps:$4 sm:$0xff]   ;;  %v2695_v16 = vld [vmem:[#allocation7 + $0xac] ss:$16 sps:$4 sm:$0xff]   ;;  %v2699_v17 = vld [vmem:[#allocation7 + $0xa0] ss:$16 sps:$4 sm:$0xff]  }
  0x52   :  { %2029 = vmatmul.mubr.msk.bf16.vlgmr.msra.gmra.mxu0 %vm165_vm0, %v118_v6  ;;  %2030 = vmatmul.mubr.msk.bf16.vlgmr.msra.gmra.mxu1 %vm165_vm0, %v118_v6  ;;  %v2703_v18 = vld [vmem:[#allocation7 + $0xa8] ss:$16 sps:$4 sm:$0xff]   ;;  %v2707_v19 = vld [vmem:[#allocation7 + $0x84] ss:$16 sps:$4 sm:$0xff]   ;;  %v2709_v20 = vld [vmem:[#allocation7 + $0x8c] ss:$16 sps:$4 sm:$0xff]  }
  0x53   :  { %444 = vmatpush1.bf16.msra.mxu0 %v2676_v9  ;;  %485 = vmatpush1.bf16.msra.mxu1 %v2678_v10  ;;  %v2711_v21 = vld [vmem:[#allocation7 + $0x80] ss:$16 sps:$4 sm:$0xff]   ;;  %v2713_v22 = vld [vmem:[#allocation7 + $0x88] ss:$16 sps:$4 sm:$0xff]   ;;  %v2717_v23 = vld [vmem:[#allocation7 + $0x64] ss:$16 sps:$4 sm:$0xff]  }
  0x54   :  { %445 = vmatprep.subr.bf16.mxu0 %v2681_v11  ;;  %486 = vmatprep.subr.bf16.mxu1 %v2683_v12  ;;  %v2721_v24 = vld [vmem:[#allocation7 + $0x6c] ss:$16 sps:$4 sm:$0xff]   ;;  %v2723_v25 = vld [vmem:[#allocation7 + $0x60] ss:$16 sps:$4 sm:$0xff]   ;;  %v2727_v26 = vld [vmem:[#allocation7 + $0x68] ss:$16 sps:$4 sm:$0xff]  }
  0x55   :  { %475 = vmatprep.mubr.bf16.mxu0 %v2582_v0  ;;  %516 = vmatprep.mubr.bf16.mxu1 %v2582_v0  ;;  %v2731_v27 = vld [vmem:[#allocation7 + $0x44] ss:$16 sps:$4 sm:$0xff]   ;;  %v2733_v28 = vld [vmem:[#allocation7 + $0x4c] ss:$16 sps:$4 sm:$0xff]   ;;  %v2735_v29 = vld [vmem:[#allocation7 + $0x40] ss:$16 sps:$4 sm:$0xff]  }
  0x56   :  { %v2737_v30 = vld [vmem:[#allocation7 + $0x48] ss:$16 sps:$4 sm:$0xff]   ;;  %v2741_v31 = vld [vmem:[#allocation7 + $0x24] ss:$16 sps:$4 sm:$0xff]   ;;  %v2743_v32 = vld [vmem:[#allocation7 + $0x2c] ss:$16 sps:$4 sm:$0xff]  }
  0x57   :  { %446 = vmatpush1.bf16.msra.mxu0 %v2685_v13  ;;  %487 = vmatpush1.bf16.msra.mxu1 %v2689_v14  ;;  %v2747_v33 = vld [vmem:[#allocation7 + $0x20] ss:$16 sps:$4 sm:$0xff]   ;;  %v2749_v34 = vld [vmem:[#allocation7 + $0x28] ss:$16 sps:$4 sm:$0xff]   ;;  %v2751_v35 = vld [vmem:[#allocation7 + $0x4] ss:$16 sps:$4 sm:$0xff]  }
  0x58   :  { %447 = vmatprep.subr.bf16.mxu0 %v2693_v15  ;;  %488 = vmatprep.subr.bf16.mxu1 %v2695_v16  ;;  %v2753_v36 = vld [vmem:[#allocation7 + $0xc] ss:$16 sps:$4 sm:$0xff]   ;;  %v2759_v37 = vld [vmem:[#allocation7] ss:$16 sps:$4 sm:$0xff]   ;;  %v2761_v38 = vld [vmem:[#allocation7 + $0x8] ss:$16 sps:$4 sm:$0xff]  }
  0x59   :  { %v2807_v49 = vsub.s32 0, %v126_v48  ;;  %v123_v50 = vld [vmem:[%s3195_s3] sm:$0xf]  ;;  %v2812_v51 = vsub.s32 1, %v126_v48  ;;  %v139_v54 = vsub.s32 3, %v126_v48  ;;  %v135_v63 = vsub.s32 2, %v126_v48 }
  0x5a   :  { %vm1410_vm1 = vcmask 1040384   ;;  %vm1412_vm2 = vcmask 1041408   ;;  %vm1414_vm3 = vcmask 1042432   ;;  %vm1416_vm4 = vcmask 1043456  }
  0x5b   :  { %448 = vmatpush1.bf16.msra.mxu0 %v2699_v17  ;;  %489 = vmatpush1.bf16.msra.mxu1 %v2703_v18  ;;  %v128_v52 = vrot.slane %v123_v50, %v2807_v49  ;;  %v132_v53 = vrot.slane %v123_v50, %v2812_v51  ;;  %v140_v59 = vrot.slane %v123_v50, %v139_v54  ;;  %vm1418_vm5 = vcmask 1044480  }
  0x5c   :  { %449 = vmatprep.subr.bf16.mxu0 %v2707_v19  ;;  %490 = vmatprep.subr.bf16.mxu1 %v2709_v20  ;;  %vm1420_vm6 = vcmask 1045504   ;;  %vm1422_vm7 = vcmask 1046528  }
  0x5f   :  { %450 = vmatpush1.bf16.msra.mxu0 %v2711_v21  ;;  %491 = vmatpush1.bf16.msra.mxu1 %v2713_v22 }
  0x60   :  { %451 = vmatprep.subr.bf16.mxu0 %v2717_v23  ;;  %492 = vmatprep.subr.bf16.mxu1 %v2721_v24 }
  0x63   :  { %452 = vmatpush1.bf16.msra.mxu0 %v2723_v25  ;;  %493 = vmatpush1.bf16.msra.mxu1 %v2727_v26 }
  0x64   :  { %453 = vmatprep.subr.bf16.mxu0 %v2731_v27  ;;  %494 = vmatprep.subr.bf16.mxu1 %v2733_v28 }
  0x67   :  { %454 = vmatpush1.bf16.msra.mxu0 %v2735_v29  ;;  %495 = vmatpush1.bf16.msra.mxu1 %v2737_v30 }
  0x68   :  { %455 = vmatprep.subr.bf16.mxu0 %v2741_v31  ;;  %496 = vmatprep.subr.bf16.mxu1 %v2743_v32 }
  0x6b   :  { %456 = vmatpush1.bf16.msra.mxu0 %v2747_v33  ;;  %497 = vmatpush1.bf16.msra.mxu1 %v2749_v34 }
  0x6c   :  { %457 = vmatprep.subr.bf16.mxu0 %v2751_v35  ;;  %498 = vmatprep.subr.bf16.mxu1 %v2753_v36 }
  0x6f   :  { %458 = vmatpush1.bf16.msra.mxu0 %v2759_v37  ;;  %499 = vmatpush1.bf16.msra.mxu1 %v2761_v38 }
  0x70   :  { %548 = vmatprep.subr.bf16.mxu0 %v2671_v7  ;;  %589 = vmatprep.subr.bf16.mxu1 %v2673_v8 }
  0x72   :  { %476 = vmatmul.mubr.bf16.vlgmr.msra.gmra.mxu0 %v2582_v0  ;;  %517 = vmatmul.mubr.bf16.vlgmr.msra.gmra.mxu1 %v2582_v0 }
  0x73   :  { %549 = vmatpush1.bf16.msra.mxu0 %v2676_v9  ;;  %590 = vmatpush1.bf16.msra.mxu1 %v2678_v10 }
  0x74   :  { %550 = vmatprep.subr.bf16.mxu0 %v2681_v11  ;;  %591 = vmatprep.subr.bf16.mxu1 %v2683_v12 }
  0x75   :  { %580 = vmatprep.mubr.bf16.mxu0 %v2582_v0  ;;  %621 = vmatprep.mubr.bf16.mxu1 %v2582_v0 }
  0x77   :  { %551 = vmatpush1.bf16.msra.mxu0 %v2685_v13  ;;  %592 = vmatpush1.bf16.msra.mxu1 %v2689_v14 }
  0x78   :  { %552 = vmatprep.subr.bf16.mxu0 %v2693_v15  ;;  %593 = vmatprep.subr.bf16.mxu1 %v2695_v16 }
  0x7b   :  { %553 = vmatpush1.bf16.msra.mxu0 %v2699_v17  ;;  %594 = vmatpush1.bf16.msra.mxu1 %v2703_v18 }
  0x7c   :  { %554 = vmatprep.subr.bf16.mxu0 %v2707_v19  ;;  %595 = vmatprep.subr.bf16.mxu1 %v2709_v20 }
  0x7f   :  { %555 = vmatpush1.bf16.msra.mxu0 %v2711_v21  ;;  %596 = vmatpush1.bf16.msra.mxu1 %v2713_v22 }
  0x80   :  { %556 = vmatprep.subr.bf16.mxu0 %v2717_v23  ;;  %597 = vmatprep.subr.bf16.mxu1 %v2721_v24 }
  0x83   :  { %557 = vmatpush1.bf16.msra.mxu0 %v2723_v25  ;;  %598 = vmatpush1.bf16.msra.mxu1 %v2727_v26 }
  0x84   :  { %558 = vmatprep.subr.bf16.mxu0 %v2731_v27  ;;  %599 = vmatprep.subr.bf16.mxu1 %v2733_v28 }
  0x87   :  { %559 = vmatpush1.bf16.msra.mxu0 %v2735_v29  ;;  %600 = vmatpush1.bf16.msra.mxu1 %v2737_v30 }
  0x88   :  { %560 = vmatprep.subr.bf16.mxu0 %v2741_v31  ;;  %601 = vmatprep.subr.bf16.mxu1 %v2743_v32 }
  0x8b   :  { %561 = vmatpush1.bf16.msra.mxu0 %v2747_v33  ;;  %602 = vmatpush1.bf16.msra.mxu1 %v2749_v34 }
  0x8c   :  { %562 = vmatprep.subr.bf16.mxu0 %v2751_v35  ;;  %603 = vmatprep.subr.bf16.mxu1 %v2753_v36 }
  0x8f   :  { %563 = vmatpush1.bf16.msra.mxu0 %v2759_v37  ;;  %604 = vmatpush1.bf16.msra.mxu1 %v2761_v38 }
  0x90   :  { %672 = vmatprep.subr.bf16.mxu0 %v2671_v7  ;;  %713 = vmatprep.subr.bf16.mxu1 %v2673_v8 }
 0x112   :  { %v203_v39 = vpop.f32.mrf.mxu0  ;;  %v244_v40 = vpop.f32.mrf.mxu1 }
 0x113   :  { %v2816_v55 = vadd.f32 %v203_v39, %v128_v52 }
 0x114   :  { %v205_v41 = vpop.f32.mrf.mxu0  ;;  %v246_v42 = vpop.f32.mrf.mxu1 }
 0x115   :  { %v2818_v58 = vadd.f32 %v205_v41, %v132_v53  ;;  %v2822_v5 = vadd.f32 %v246_v42, %v140_v59 }
 0x116   :  { %v207_v43 = vpop.f32.mrf.mxu0  ;;  %v248_v44 = vpop.f32.mrf.mxu1 }
 0x117   :  { %v136_v44 = vrot.slane %v123_v50, %v135_v63 }
 0x118   :  { %v208_v45 = vpop.f32.mrf.mxu0  ;;  %v249_v46 = vpop.f32.mrf.mxu1 }
 0x119   :  { %v2825_v45 = vadd.f32 %v244_v40, %v136_v44 }
 0x132   :  { %v477_v56 = vpop.f32.mrf.mxu0  ;;  %v518_v57 = vpop.f32.mrf.mxu1 }
 0x133   :  { %v525_v60 = vadd.f32 %v477_v56, %v2816_v55  ;;  %v527_v46 = vadd.f32 %v518_v57, %v2825_v45 }
 0x134   :  { %v479_v61 = vpop.f32.mrf.mxu0  ;;  %v520_v62 = vpop.f32.mrf.mxu1 }
 0x135   :  { %v529_v1 = vmul.f32 0.5, %v525_v60  ;;  %v526_v2 = vadd.f32 %v479_v61, %v2818_v58  ;;  %v528_v41 = vadd.f32 %v520_v62, %v2822_v5  ;;  %v531_v47 = vmul.f32 0.5, %v527_v46 }
 0x136   :  { %v481_v3 = vpop.f32.mrf.mxu0  ;;  %v522_v4 = vpop.f32.mrf.mxu1 }
 0x137   :  { %2306 = vtanh.f32 %v529_v1  ;;  %v530_v6 = vmul.f32 0.5, %v526_v2 }
 0x138   :  { %v482_v39 = vpop.f32.mrf.mxu0  ;;  %v523_v43 = vpop.f32.mrf.mxu1 }
 0x139   :  { %2308 = vtanh.f32 %v530_v6 }
 0x13a   :  { %2310 = vtanh.f32 %v528_v41 }
 0x13b   :  { %2312 = vtanh.f32 %v531_v47 }
 0x144   :  { %v2307_v48 = vpop.eup %2306 }
 0x145   :  { %v535_v52 = vadd.f32 1.0, %v2307_v48 }
 0x146   :  { %v2309_v53 = vpop.eup %2308 }
 0x147   :  { %v538_v54 = vmul.f32 0.5, %v535_v52  ;;  %v536_v42 = vadd.f32 1.0, %v2309_v53  ;;  %v2311_v59 = vpop.eup %2310 }
 0x148   :  { %v2313_v40 = vpop.eup %2312 }
 0x149   :  { %v539_v56 = vmul.f32 0.5, %v536_v42  ;;  %v543_v61 = vmul.f32 %v2311_v59, %v538_v54  ;;  %v537_v62 = vadd.f32 1.0, %v2313_v40 }
 0x14b   :  { %v542_v60 = vmul.f32 0.0, %v539_v56  ;;  %v540_v63 = vmul.f32 0.5, %v537_v62 }
 0x14d   :  { %v2828_v50 = vadd.f32 %v543_v61, %v542_v60 }
 0x14f   :  { %2314 = vtanh.f32 %v2828_v50 }
 0x15c   :  { %v2315_v1 = vpop.eup %2314 }
 0x15d   :  { %v2831_v57 = vmul.f32 %v2315_v1, %v540_v63 }
 0x15f   :  { %v547_v2 = vpack.c.bf16 %v2831_v57, %v2831_v57 }
 0x161   :  { %581 = vmatmul.mubr.bf16.vlgmr.msra.gmra.mxu0 %v547_v2  ;;  %622 = vmatmul.mubr.bf16.vlgmr.msra.gmra.mxu1 %v547_v2 }
 0x162   :  { %673 = vmatpush1.bf16.msra.mxu0 %v2676_v9  ;;  %714 = vmatpush1.bf16.msra.mxu1 %v2678_v10 }
 0x163   :  { %674 = vmatprep.subr.bf16.mxu0 %v2681_v11  ;;  %715 = vmatprep.subr.bf16.mxu1 %v2683_v12 }
 0x164   :  { %704 = vmatprep.mubr.bf16.mxu0 %v2582_v0  ;;  %745 = vmatprep.mubr.bf16.mxu1 %v2582_v0 }
 0x166   :  { %675 = vmatpush1.bf16.msra.mxu0 %v2685_v13  ;;  %716 = vmatpush1.bf16.msra.mxu1 %v2689_v14 }
 0x167   :  { %676 = vmatprep.subr.bf16.mxu0 %v2693_v15  ;;  %717 = vmatprep.subr.bf16.mxu1 %v2695_v16 }
 0x16a   :  { %677 = vmatpush1.bf16.msra.mxu0 %v2699_v17  ;;  %718 = vmatpush1.bf16.msra.mxu1 %v2703_v18 }
 0x16b   :  { %678 = vmatprep.subr.bf16.mxu0 %v2707_v19  ;;  %719 = vmatprep.subr.bf16.mxu1 %v2709_v20 }
 0x16e   :  { %679 = vmatpush1.bf16.msra.mxu0 %v2711_v21  ;;  %720 = vmatpush1.bf16.msra.mxu1 %v2713_v22 }
 0x16f   :  { %680 = vmatprep.subr.bf16.mxu0 %v2717_v23  ;;  %721 = vmatprep.subr.bf16.mxu1 %v2721_v24 }
 0x172   :  { %681 = vmatpush1.bf16.msra.mxu0 %v2723_v25  ;;  %722 = vmatpush1.bf16.msra.mxu1 %v2727_v26 }
 0x173   :  { %682 = vmatprep.subr.bf16.mxu0 %v2731_v27  ;;  %723 = vmatprep.subr.bf16.mxu1 %v2733_v28 }
 0x176   :  { %683 = vmatpush1.bf16.msra.mxu0 %v2735_v29  ;;  %724 = vmatpush1.bf16.msra.mxu1 %v2737_v30 }
 0x177   :  { %684 = vmatprep.subr.bf16.mxu0 %v2741_v31  ;;  %725 = vmatprep.subr.bf16.mxu1 %v2743_v32 }
 0x17a   :  { %685 = vmatpush1.bf16.msra.mxu0 %v2747_v33  ;;  %726 = vmatpush1.bf16.msra.mxu1 %v2749_v34 }
 0x17b   :  { %686 = vmatprep.subr.bf16.mxu0 %v2751_v35  ;;  %727 = vmatprep.subr.bf16.mxu1 %v2753_v36 }
 0x17e   :  { %687 = vmatpush1.bf16.msra.mxu0 %v2759_v37  ;;  %728 = vmatpush1.bf16.msra.mxu1 %v2761_v38 }
 0x17f   :  { %795 = vmatprep.subr.bf16.mxu0 %v2671_v7  ;;  %836 = vmatprep.subr.bf16.mxu1 %v2673_v8 }
 0x221   :  { %v582_v3 = vpop.f32.mrf.mxu0  ;;  %v623_v4 = vpop.f32.mrf.mxu1 }
 0x222   :  { %v634_v6 = vrot.slane %v582_v3, 7  ;;  %v636_v60 = vrot.slane %v623_v4, 7 }
 0x223   :  { %v584_v39 = vpop.f32.mrf.mxu0  ;;  %v625_v43 = vpop.f32.mrf.mxu1 }
 0x224   :  { %v642_v44 = vadd.f32 %v634_v6, %v2816_v55  ;;  %v635_v41 = vrot.slane %v584_v39, 7  ;;  %v637_v53 = vrot.slane %v625_v43, 7  ;;  %v644_v61 = vadd.f32 %v636_v60, %v2825_v45 }
 0x225   :  { %v586_v46 = vpop.f32.mrf.mxu0  ;;  %v627_v47 = vpop.f32.mrf.mxu1  ;;  %v660_v39 = vrot.slane %v2828_v50, 7 }
 0x226   :  { %v646_v48 = vmul.f32 0.5, %v642_v44  ;;  %v643_v52 = vadd.f32 %v635_v41, %v2818_v58  ;;  %v645_v59 = vadd.f32 %v637_v53, %v2822_v5  ;;  %v648_v40 = vmul.f32 0.5, %v644_v61 }
 0x227   :  { %v587_v54 = vpop.f32.mrf.mxu0  ;;  %v628_v42 = vpop.f32.mrf.mxu1 }
 0x228   :  { %2316 = vtanh.f32 %v646_v48  ;;  %v647_v56 = vmul.f32 0.5, %v643_v52 }
 0x22a   :  { %2318 = vtanh.f32 %v647_v56 }
 0x22b   :  { %2320 = vtanh.f32 %v645_v59 }
 0x22c   :  { %2322 = vtanh.f32 %v648_v40 }
 0x235   :  { %v2317_v62 = vpop.eup %2316 }
 0x236   :  { %v652_v63 = vadd.f32 1.0, %v2317_v62 }
 0x237   :  { %v2319_v1 = vpop.eup %2318 }
 0x238   :  { %v655_v2 = vmul.f32 0.5, %v652_v63  ;;  %v653_v3 = vadd.f32 1.0, %v2319_v1  ;;  %v2321_v43 = vpop.eup %2320 }
 0x239   :  { %v2323_v4 = vpop.eup %2322 }
 0x23a   :  { %v656_v6 = vmul.f32 0.5, %v653_v3  ;;  %v663_v41 = vmul.f32 %v2321_v43, %v655_v2  ;;  %v654_v47 = vadd.f32 1.0, %v2323_v4 }
 0x23c   :  { %v662_v44 = vmul.f32 %v660_v39, %v656_v6  ;;  %v657_v48 = vmul.f32 0.5, %v654_v47 }
 0x23e   :  { %v2874_v46 = vadd.f32 %v663_v41, %v662_v44 }
 0x240   :  { %2324 = vtanh.f32 %v2874_v46 }
 0x24d   :  { %v2325_v52 = vpop.eup %2324 }
 0x24e   :  { %v2877_v53 = vmul.f32 %v2325_v52, %v657_v48 }
 0x250   :  { %v667_v54 = vpack.c.bf16 %v2877_v53, %v2877_v53 }
 0x252   :  { %v669_v42 = vshrl.u32 %v667_v54, 16 }
 0x254   :  { %705 = vmatmul.mubr.bf16.vlgmr.msra.gmra.mxu0 %v669_v42  ;;  %746 = vmatmul.mubr.bf16.vlgmr.msra.gmra.mxu1 %v669_v42 }
 0x255   :  { %796 = vmatpush1.bf16.msra.mxu0 %v2676_v9  ;;  %837 = vmatpush1.bf16.msra.mxu1 %v2678_v10 }
 0x256   :  { %797 = vmatprep.subr.bf16.mxu0 %v2681_v11  ;;  %838 = vmatprep.subr.bf16.mxu1 %v2683_v12 }
 0x257   :  { %827 = vmatprep.mubr.bf16.mxu0 %v2582_v0  ;;  %868 = vmatprep.mubr.bf16.mxu1 %v2582_v0 }
 0x259   :  { %798 = vmatpush1.bf16.msra.mxu0 %v2685_v13  ;;  %839 = vmatpush1.bf16.msra.mxu1 %v2689_v14 }
 0x25a   :  { %799 = vmatprep.subr.bf16.mxu0 %v2693_v15  ;;  %840 = vmatprep.subr.bf16.mxu1 %v2695_v16 }
 0x25d   :  { %800 = vmatpush1.bf16.msra.mxu0 %v2699_v17  ;;  %841 = vmatpush1.bf16.msra.mxu1 %v2703_v18 }
 0x25e   :  { %801 = vmatprep.subr.bf16.mxu0 %v2707_v19  ;;  %842 = vmatprep.subr.bf16.mxu1 %v2709_v20 }
 0x261   :  { %802 = vmatpush1.bf16.msra.mxu0 %v2711_v21  ;;  %843 = vmatpush1.bf16.msra.mxu1 %v2713_v22 }
 0x262   :  { %803 = vmatprep.subr.bf16.mxu0 %v2717_v23  ;;  %844 = vmatprep.subr.bf16.mxu1 %v2721_v24 }
 0x265   :  { %804 = vmatpush1.bf16.msra.mxu0 %v2723_v25  ;;  %845 = vmatpush1.bf16.msra.mxu1 %v2727_v26 }
 0x266   :  { %805 = vmatprep.subr.bf16.mxu0 %v2731_v27  ;;  %846 = vmatprep.subr.bf16.mxu1 %v2733_v28 }
 0x269   :  { %806 = vmatpush1.bf16.msra.mxu0 %v2735_v29  ;;  %847 = vmatpush1.bf16.msra.mxu1 %v2737_v30 }
 0x26a   :  { %807 = vmatprep.subr.bf16.mxu0 %v2741_v31  ;;  %848 = vmatprep.subr.bf16.mxu1 %v2743_v32 }
 0x26d   :  { %808 = vmatpush1.bf16.msra.mxu0 %v2747_v33  ;;  %849 = vmatpush1.bf16.msra.mxu1 %v2749_v34 }
 0x26e   :  { %809 = vmatprep.subr.bf16.mxu0 %v2751_v35  ;;  %850 = vmatprep.subr.bf16.mxu1 %v2753_v36 }
 0x271   :  { %810 = vmatpush1.bf16.msra.mxu0 %v2759_v37  ;;  %851 = vmatpush1.bf16.msra.mxu1 %v2761_v38 }
 0x272   :  { %920 = vmatprep.subr.bf16.mxu0 %v2671_v7  ;;  %961 = vmatprep.subr.bf16.mxu1 %v2673_v8 }
 0x314   :  { %v706_v50 = vpop.f32.mrf.mxu0  ;;  %v747_v56 = vpop.f32.mrf.mxu1 }
 0x315   :  { %v758_v59 = vrot.slane %v706_v50, 6  ;;  %v760_v4 = vrot.slane %v747_v56, 6 }
 0x316   :  { %v708_v60 = vpop.f32.mrf.mxu0  ;;  %v749_v61 = vpop.f32.mrf.mxu1 }
 0x317   :  { %v766_v40 = vadd.f32 %v758_v59, %v2816_v55  ;;  %v759_v62 = vrot.slane %v708_v60, 6  ;;  %v761_v6 = vrot.slane %v749_v61, 6  ;;  %v768_v47 = vadd.f32 %v760_v4, %v2825_v45 }
 0x318   :  { %v710_v63 = vpop.f32.mrf.mxu0  ;;  %v751_v1 = vpop.f32.mrf.mxu1  ;;  %v784_v61 = vrot.slane %v2874_v46, 7 }
 0x319   :  { %v770_v2 = vmul.f32 0.5, %v766_v40  ;;  %v767_v3 = vadd.f32 %v759_v62, %v2818_v58  ;;  %v769_v41 = vadd.f32 %v761_v6, %v2822_v5  ;;  %v772_v48 = vmul.f32 0.5, %v768_v47 }
 0x31a   :  { %v711_v39 = vpop.f32.mrf.mxu0  ;;  %v752_v43 = vpop.f32.mrf.mxu1 }
 0x31b   :  { %2326 = vtanh.f32 %v770_v2  ;;  %v771_v44 = vmul.f32 0.5, %v767_v3  ;;  %v1411_v43 = vsel %vm1410_vm1, %v2831_v57, %v2877_v53 }
 0x31d   :  { %2328 = vtanh.f32 %v771_v44 }
 0x31e   :  { %2330 = vtanh.f32 %v769_v41 }
 0x31f   :  { %2332 = vtanh.f32 %v772_v48 }
 0x328   :  { %v2327_v52 = vpop.eup %2326 }
 0x329   :  { %v776_v54 = vadd.f32 1.0, %v2327_v52 }
 0x32a   :  { %v2329_v42 = vpop.eup %2328 }
 0x32b   :  { %v779_v50 = vmul.f32 0.5, %v776_v54  ;;  %v777_v59 = vadd.f32 1.0, %v2329_v42  ;;  %v2331_v40 = vpop.eup %2330 }
 0x32c   :  { %v2333_v56 = vpop.eup %2332 }
 0x32d   :  { %v780_v60 = vmul.f32 0.5, %v777_v59  ;;  %v787_v63 = vmul.f32 %v2331_v40, %v779_v50  ;;  %v778_v2 = vadd.f32 1.0, %v2333_v56 }
 0x32f   :  { %v786_v62 = vmul.f32 %v784_v61, %v780_v60  ;;  %v781_v3 = vmul.f32 0.5, %v778_v2 }
 0x331   :  { %v2920_v1 = vadd.f32 %v787_v63, %v786_v62 }
 0x333   :  { %2334 = vtanh.f32 %v2920_v1 }
 0x340   :  { %v2335_v6 = vpop.eup %2334 }
 0x341   :  { %v790_v39 = vmul.f32 %v2335_v6, %v781_v3 }
 0x343   :  { %v791_v44 = vpack.c.bf16 %v790_v39, %v790_v39  ;;  %v2925_v41 = vsel %vm1412_vm2, %v1411_v43, %v790_v39 }
 0x345   :  { %v793_v46 = vrot.slane %v791_v44, 1  ;;  %v907_v44 = vrot.slane %v2920_v1, 7  ;;  %v2972_v1 = vld [vmem:[#allocation7 + $0xe0] ss:$16 sps:$4 sm:$0xff]  }
 0x347   :  { %828 = vmatmul.mubr.bf16.vlgmr.msra.gmra.mxu0 %v793_v46  ;;  %869 = vmatmul.mubr.bf16.vlgmr.msra.gmra.mxu1 %v793_v46 }
 0x348   :  { %921 = vmatpush1.bf16.msra.mxu0 %v2676_v9  ;;  %962 = vmatpush1.bf16.msra.mxu1 %v2678_v10 }
 0x349   :  { %922 = vmatprep.subr.bf16.mxu0 %v2681_v11  ;;  %963 = vmatprep.subr.bf16.mxu1 %v2683_v12 }
 0x34a   :  { %952 = vmatprep.mubr.bf16.mxu0 %v2582_v0  ;;  %993 = vmatprep.mubr.bf16.mxu1 %v2582_v0 }
 0x34c   :  { %923 = vmatpush1.bf16.msra.mxu0 %v2685_v13  ;;  %964 = vmatpush1.bf16.msra.mxu1 %v2689_v14 }
 0x34d   :  { %924 = vmatprep.subr.bf16.mxu0 %v2693_v15  ;;  %965 = vmatprep.subr.bf16.mxu1 %v2695_v16 }
 0x350   :  { %925 = vmatpush1.bf16.msra.mxu0 %v2699_v17  ;;  %966 = vmatpush1.bf16.msra.mxu1 %v2703_v18 }
 0x351   :  { %926 = vmatprep.subr.bf16.mxu0 %v2707_v19  ;;  %967 = vmatprep.subr.bf16.mxu1 %v2709_v20 }
 0x354   :  { %927 = vmatpush1.bf16.msra.mxu0 %v2711_v21  ;;  %968 = vmatpush1.bf16.msra.mxu1 %v2713_v22 }
 0x355   :  { %928 = vmatprep.subr.bf16.mxu0 %v2717_v23  ;;  %969 = vmatprep.subr.bf16.mxu1 %v2721_v24 }
 0x358   :  { %929 = vmatpush1.bf16.msra.mxu0 %v2723_v25  ;;  %970 = vmatpush1.bf16.msra.mxu1 %v2727_v26 }
 0x359   :  { %930 = vmatprep.subr.bf16.mxu0 %v2731_v27  ;;  %971 = vmatprep.subr.bf16.mxu1 %v2733_v28 }
 0x35c   :  { %931 = vmatpush1.bf16.msra.mxu0 %v2735_v29  ;;  %972 = vmatpush1.bf16.msra.mxu1 %v2737_v30 }
 0x35d   :  { %932 = vmatprep.subr.bf16.mxu0 %v2741_v31  ;;  %973 = vmatprep.subr.bf16.mxu1 %v2743_v32 }
 0x360   :  { %933 = vmatpush1.bf16.msra.mxu0 %v2747_v33  ;;  %974 = vmatpush1.bf16.msra.mxu1 %v2749_v34 }
 0x361   :  { %934 = vmatprep.subr.bf16.mxu0 %v2751_v35  ;;  %975 = vmatprep.subr.bf16.mxu1 %v2753_v36 }
 0x364   :  { %935 = vmatpush1.bf16.msra.mxu0 %v2759_v37  ;;  %976 = vmatpush1.bf16.msra.mxu1 %v2761_v38 }
 0x365   :  { %1043 = vmatprep.subr.bf16.mxu0 %v2671_v7  ;;  %1084 = vmatprep.subr.bf16.mxu1 %v2673_v8 }
 0x407   :  { %v829_v9 = vpop.f32.mrf.mxu0  ;;  %v870_v10 = vpop.f32.mrf.mxu1 }
 0x408   :  { %v881_v57 = vrot.slane %v829_v9, 5  ;;  %v883_v40 = vrot.slane %v870_v10, 5 }
 0x409   :  { %v831_v53 = vpop.f32.mrf.mxu0  ;;  %v872_v4 = vpop.f32.mrf.mxu1 }
 0x40a   :  { %v889_v47 = vadd.f32 %v881_v57, %v2816_v55  ;;  %v882_v48 = vrot.slane %v831_v53, 5  ;;  %v884_v59 = vrot.slane %v872_v4, 5  ;;  %v891_v62 = vadd.f32 %v883_v40, %v2825_v45 }
 0x40b   :  { %v833_v52 = vpop.f32.mrf.mxu0  ;;  %v874_v54 = vpop.f32.mrf.mxu1 }
 0x40c   :  { %v893_v42 = vmul.f32 0.5, %v889_v47  ;;  %v890_v50 = vadd.f32 %v882_v48, %v2818_v58  ;;  %v892_v8 = vadd.f32 %v884_v59, %v2822_v5  ;;  %v895_v63 = vmul.f32 0.5, %v891_v62 }
 0x40d   :  { %v834_v60 = vpop.f32.mrf.mxu0  ;;  %v875_v61 = vpop.f32.mrf.mxu1 }
 0x40e   :  { %2336 = vtanh.f32 %v893_v42  ;;  %v894_v7 = vmul.f32 0.5, %v890_v50  ;;  %v2975_v60 = vld [vmem:[#allocation7 + $0xe8] ss:$16 sps:$4 sm:$0xff]  }
 0x410   :  { %2338 = vtanh.f32 %v894_v7 }
 0x411   :  { %2340 = vtanh.f32 %v892_v8 }
 0x412   :  { %2342 = vtanh.f32 %v895_v63 }
 0x41b   :  { %v2337_v56 = vpop.eup %2336 }
 0x41c   :  { %v899_v2 = vadd.f32 1.0, %v2337_v56 }
 0x41d   :  { %v2339_v3 = vpop.eup %2338 }
 0x41e   :  { %v902_v6 = vmul.f32 0.5, %v899_v2  ;;  %v900_v39 = vadd.f32 1.0, %v2339_v3  ;;  %v2341_v46 = vpop.eup %2340 }
 0x41f   :  { %v2343_v10 = vpop.eup %2342 }
 0x420   :  { %v903_v43 = vmul.f32 0.5, %v900_v39  ;;  %v910_v57 = vmul.f32 %v2341_v46, %v902_v6  ;;  %v901_v4 = vadd.f32 1.0, %v2343_v10  ;;  %v3035_v46 = vld [vmem:[#allocation7 + $0xc0] ss:$16 sps:$4 sm:$0xff]  }
 0x421   :  { %v3047_v10 = vld [vmem:[#allocation7 + $0xa0] ss:$16 sps:$4 sm:$0xff]  }
 0x422   :  { %v909_v9 = vmul.f32 %v907_v44, %v903_v43  ;;  %v904_v47 = vmul.f32 0.5, %v901_v4  ;;  %v3027_v43 = vld [vmem:[#allocation7 + $0xc4] ss:$16 sps:$4 sm:$0xff]   ;;  %v3030_v44 = vld [vmem:[#allocation7 + $0xcc] ss:$16 sps:$4 sm:$0xff]  }
 0x423   :  { %v3050_v4 = vld [vmem:[#allocation7 + $0xa8] ss:$16 sps:$4 sm:$0xff]  }
 0x424   :  { %v2966_v53 = vadd.f32 %v910_v57, %v909_v9  ;;  %v3038_v9 = vld [vmem:[#allocation7 + $0xc8] ss:$16 sps:$4 sm:$0xff]   ;;  %v3041_v57 = vld [vmem:[#allocation7 + $0xa4] ss:$16 sps:$4 sm:$0xff]  }
 0x426   :  { %2344 = vtanh.f32 %v2966_v53 }
 0x433   :  { %v2345_v48 = vpop.eup %2344 }
 0x434   :  { %v913_v52 = vmul.f32 %v2345_v48, %v904_v47  ;;  %v3053_v47 = vld [vmem:[#allocation7 + $0x84] ss:$16 sps:$4 sm:$0xff]   ;;  %v3056_v48 = vld [vmem:[#allocation7 + $0x8c] ss:$16 sps:$4 sm:$0xff]  }
 0x436   :  { %v914_v54 = vpack.c.bf16 %v913_v52, %v913_v52  ;;  %v2970_v42 = vsel %vm1414_vm3, %v2925_v41, %v913_v52  ;;  %v3059_v52 = vld [vmem:[#allocation7 + $0x80] ss:$16 sps:$4 sm:$0xff]  }
 0x438   :  { %v916_v50 = vshrl.u32 %v914_v54, 16  ;;  %v3062_v54 = vld [vmem:[#allocation7 + $0x88] ss:$16 sps:$4 sm:$0xff]  }
 0x43a   :  { %v918_v59 = vrot.slane %v916_v50, 1  ;;  %v3068_v50 = vld [vmem:[#allocation7 + $0x6c] ss:$16 sps:$4 sm:$0xff]  }
 0x43c   :  { %953 = vmatmul.mubr.bf16.vlgmr.msra.gmra.mxu0 %v918_v59  ;;  %994 = vmatmul.mubr.bf16.vlgmr.msra.gmra.mxu1 %v918_v59  ;;  %v3071_v59 = vld [vmem:[#allocation7 + $0x60] ss:$16 sps:$4 sm:$0xff]  }
 0x43d   :  { %1044 = vmatpush1.bf16.msra.mxu0 %v2972_v1  ;;  %1085 = vmatpush1.bf16.msra.mxu1 %v2975_v60 }
 0x43e   :  { %1045 = vmatprep.subr.bf16.mxu0 %v2681_v11  ;;  %1086 = vmatprep.subr.bf16.mxu1 %v2683_v12  ;;  %v3008_v11 = vld [vmem:[#allocation7 + $0xe4] ss:$16 sps:$4 sm:$0xff]   ;;  %v3011_v12 = vld [vmem:[#allocation7 + $0xec] ss:$16 sps:$4 sm:$0xff]  }
 0x43f   :  { %1075 = vmatprep.mubr.bf16.mxu0 %v2582_v0  ;;  %1116 = vmatprep.mubr.bf16.mxu1 %v2582_v0 }
 0x441   :  { %1046 = vmatpush1.bf16.msra.mxu0 %v2685_v13  ;;  %1087 = vmatpush1.bf16.msra.mxu1 %v2689_v14 }
 0x442   :  { %1047 = vmatprep.subr.bf16.mxu0 %v2693_v15  ;;  %1088 = vmatprep.subr.bf16.mxu1 %v2695_v16 }
 0x445   :  { %1048 = vmatpush1.bf16.msra.mxu0 %v2699_v17  ;;  %1089 = vmatpush1.bf16.msra.mxu1 %v2703_v18 }
 0x446   :  { %1049 = vmatprep.subr.bf16.mxu0 %v2707_v19  ;;  %1090 = vmatprep.subr.bf16.mxu1 %v2709_v20 }
 0x449   :  { %1050 = vmatpush1.bf16.msra.mxu0 %v2711_v21  ;;  %1091 = vmatpush1.bf16.msra.mxu1 %v2713_v22 }
 0x44a   :  { %1051 = vmatprep.subr.bf16.mxu0 %v2717_v23  ;;  %1092 = vmatprep.subr.bf16.mxu1 %v2721_v24 }
 0x44d   :  { %1052 = vmatpush1.bf16.msra.mxu0 %v2723_v25  ;;  %1093 = vmatpush1.bf16.msra.mxu1 %v2727_v26 }
 0x44e   :  { %1053 = vmatprep.subr.bf16.mxu0 %v2731_v27  ;;  %1094 = vmatprep.subr.bf16.mxu1 %v2733_v28 }
 0x451   :  { %1054 = vmatpush1.bf16.msra.mxu0 %v2735_v29  ;;  %1095 = vmatpush1.bf16.msra.mxu1 %v2737_v30 }
 0x452   :  { %1055 = vmatprep.subr.bf16.mxu0 %v2741_v31  ;;  %1096 = vmatprep.subr.bf16.mxu1 %v2743_v32 }
 0x455   :  { %1056 = vmatpush1.bf16.msra.mxu0 %v2747_v33  ;;  %1097 = vmatpush1.bf16.msra.mxu1 %v2749_v34 }
 0x456   :  { %1057 = vmatprep.subr.bf16.mxu0 %v2751_v35  ;;  %1098 = vmatprep.subr.bf16.mxu1 %v2753_v36 }
 0x459   :  { %1058 = vmatpush1.bf16.msra.mxu0 %v2759_v37  ;;  %1099 = vmatpush1.bf16.msra.mxu1 %v2761_v38  ;;  %v1032_v38 = vrot.slane %v2966_v53, 7  ;;  %v3044_v53 = vld [vmem:[#allocation7 + $0xac] ss:$16 sps:$4 sm:$0xff]  }
 0x45a   :  { %1168 = vmatprep.subr.bf16.mxu0 %v3008_v11  ;;  %1209 = vmatprep.subr.bf16.mxu1 %v3011_v12 }
 0x4fc   :  { %v954_v13 = vpop.f32.mrf.mxu0  ;;  %v995_v14 = vpop.f32.mrf.mxu1 }
 0x4fd   :  { %v1006_v15 = vrot.slane %v954_v13, 4  ;;  %v1008_v29 = vrot.slane %v995_v14, 4  ;;  %v3074_v13 = vld [vmem:[#allocation7 + $0x68] ss:$16 sps:$4 sm:$0xff]   ;;  %v3077_v14 = vld [vmem:[#allocation7 + $0x44] ss:$16 sps:$4 sm:$0xff]  }
 0x4fe   :  { %v956_v16 = vpop.f32.mrf.mxu0  ;;  %v997_v17 = vpop.f32.mrf.mxu1 }
 0x4ff   :  { %v1014_v18 = vadd.f32 %v1006_v15, %v2816_v55  ;;  %v1007_v19 = vrot.slane %v956_v16, 4  ;;  %v1009_v24 = vrot.slane %v997_v17, 4  ;;  %v1016_v30 = vadd.f32 %v1008_v29, %v2825_v45  ;;  %v3080_v15 = vld [vmem:[#allocation7 + $0x4c] ss:$16 sps:$4 sm:$0xff]   ;;  %v3083_v16 = vld [vmem:[#allocation7 + $0x40] ss:$16 sps:$4 sm:$0xff]  }
 0x500   :  { %v958_v20 = vpop.f32.mrf.mxu0  ;;  %v999_v21 = vpop.f32.mrf.mxu1  ;;  %v3086_v17 = vld [vmem:[#allocation7 + $0x48] ss:$16 sps:$4 sm:$0xff]  }
 0x501   :  { %v1018_v22 = vmul.f32 0.5, %v1014_v18  ;;  %v1015_v23 = vadd.f32 %v1007_v19, %v2818_v58  ;;  %v1017_v28 = vadd.f32 %v1009_v24, %v2822_v5  ;;  %v1020_v31 = vmul.f32 0.5, %v1016_v30  ;;  %v3089_v18 = vld [vmem:[#allocation7 + $0x24] ss:$16 sps:$4 sm:$0xff]   ;;  %v3092_v19 = vld [vmem:[#allocation7 + $0x2c] ss:$16 sps:$4 sm:$0xff]  }
 0x502   :  { %v959_v25 = vpop.f32.mrf.mxu0  ;;  %v1000_v26 = vpop.f32.mrf.mxu1  ;;  %v3095_v20 = vld [vmem:[#allocation7 + $0x20] ss:$16 sps:$4 sm:$0xff]   ;;  %v3098_v21 = vld [vmem:[#allocation7 + $0x28] ss:$16 sps:$4 sm:$0xff]  }
 0x503   :  { %2346 = vtanh.f32 %v1018_v22  ;;  %v1019_v27 = vmul.f32 0.5, %v1015_v23  ;;  %v3101_v22 = vld [vmem:[#allocation7 + $0x4] ss:$16 sps:$4 sm:$0xff]   ;;  %v3104_v23 = vld [vmem:[#allocation7 + $0xc] ss:$16 sps:$4 sm:$0xff]  }
 0x504   :  { %v3107_v24 = vld [vmem:[#allocation7] ss:$16 sps:$4 sm:$0xff]   ;;  %v3110_v25 = vld [vmem:[#allocation7 + $0x8] ss:$16 sps:$4 sm:$0xff]  }
 0x505   :  { %2348 = vtanh.f32 %v1019_v27 }
 0x506   :  { %2350 = vtanh.f32 %v1017_v28 }
 0x507   :  { %2352 = vtanh.f32 %v1020_v31 }
 0x510   :  { %v2347_v32 = vpop.eup %2346 }
 0x511   :  { %v1024_v33 = vadd.f32 1.0, %v2347_v32 }
 0x512   :  { %v2349_v34 = vpop.eup %2348 }
 0x513   :  { %v1027_v35 = vmul.f32 0.5, %v1024_v33  ;;  %v1025_v36 = vadd.f32 1.0, %v2349_v34  ;;  %v2351_v41 = vpop.eup %2350 }
 0x514   :  { %v2353_v40 = vpop.eup %2352 }
 0x515   :  { %v1028_v37 = vmul.f32 0.5, %v1025_v36  ;;  %v1035_v7 = vmul.f32 %v2351_v41, %v1027_v35  ;;  %v1026_v62 = vadd.f32 1.0, %v2353_v40 }
 0x517   :  { %v1034_v61 = vmul.f32 %v1032_v38, %v1028_v37  ;;  %v1029_v63 = vmul.f32 0.5, %v1026_v62 }
 0x519   :  { %v3019_v8 = vadd.f32 %v1035_v7, %v1034_v61 }
 0x51b   :  { %2354 = vtanh.f32 %v3019_v8 }
 0x528   :  { %v2355_v56 = vpop.eup %2354 }
 0x529   :  { %v1038_v2 = vmul.f32 %v2355_v56, %v1029_v63 }
 0x52b   :  { %v1039_v3 = vpack.c.bf16 %v1038_v2, %v1038_v2  ;;  %v3023_v6 = vsel %vm1416_vm4, %v2970_v42, %v1038_v2  ;;  %v3065_v42 = vld [vmem:[#allocation7 + $0x64] ss:$16 sps:$4 sm:$0xff]  }
 0x52d   :  { %v1041_v39 = vrot.slane %v1039_v3, 2 }
 0x52f   :  { %1076 = vmatmul.mubr.bf16.vlgmr.msra.gmra.mxu0 %v1041_v39  ;;  %1117 = vmatmul.mubr.bf16.vlgmr.msra.gmra.mxu1 %v1041_v39 }
 0x530   :  { %1169 = vmatpush1.bf16.msra.mxu0 %v2972_v1  ;;  %1210 = vmatpush1.bf16.msra.mxu1 %v2975_v60 }
 0x531   :  { %1170 = vmatprep.subr.bf16.mxu0 %v3027_v43  ;;  %1211 = vmatprep.subr.bf16.mxu1 %v3030_v44 }
 0x532   :  { %1200 = vmatprep.mubr.bf16.mxu0 %v2582_v0  ;;  %1241 = vmatprep.mubr.bf16.mxu1 %v2582_v0 }
 0x534   :  { %1171 = vmatpush1.bf16.msra.mxu0 %v3035_v46  ;;  %1212 = vmatpush1.bf16.msra.mxu1 %v3038_v9 }
 0x535   :  { %1172 = vmatprep.subr.bf16.mxu0 %v3041_v57  ;;  %1213 = vmatprep.subr.bf16.mxu1 %v3044_v53 }
 0x538   :  { %1173 = vmatpush1.bf16.msra.mxu0 %v3047_v10  ;;  %1214 = vmatpush1.bf16.msra.mxu1 %v3050_v4 }
 0x539   :  { %1174 = vmatprep.subr.bf16.mxu0 %v3053_v47  ;;  %1215 = vmatprep.subr.bf16.mxu1 %v3056_v48 }
 0x53c   :  { %1175 = vmatpush1.bf16.msra.mxu0 %v3059_v52  ;;  %1216 = vmatpush1.bf16.msra.mxu1 %v3062_v54 }
 0x53d   :  { %1176 = vmatprep.subr.bf16.mxu0 %v3065_v42  ;;  %1217 = vmatprep.subr.bf16.mxu1 %v3068_v50 }
 0x540   :  { %1177 = vmatpush1.bf16.msra.mxu0 %v3071_v59  ;;  %1218 = vmatpush1.bf16.msra.mxu1 %v3074_v13 }
 0x541   :  { %1178 = vmatprep.subr.bf16.mxu0 %v3077_v14  ;;  %1219 = vmatprep.subr.bf16.mxu1 %v3080_v15 }
 0x544   :  { %1179 = vmatpush1.bf16.msra.mxu0 %v3083_v16  ;;  %1220 = vmatpush1.bf16.msra.mxu1 %v3086_v17 }
 0x545   :  { %1180 = vmatprep.subr.bf16.mxu0 %v3089_v18  ;;  %1221 = vmatprep.subr.bf16.mxu1 %v3092_v19 }
 0x548   :  { %1181 = vmatpush1.bf16.msra.mxu0 %v3095_v20  ;;  %1222 = vmatpush1.bf16.msra.mxu1 %v3098_v21 }
 0x549   :  { %1182 = vmatprep.subr.bf16.mxu0 %v3101_v22  ;;  %1223 = vmatprep.subr.bf16.mxu1 %v3104_v23 }
 0x54c   :  { %1183 = vmatpush1.bf16.msra.mxu0 %v3107_v24  ;;  %1224 = vmatpush1.bf16.msra.mxu1 %v3110_v25 }
 0x54d   :  { %1291 = vmatprep.subr.bf16.mxu0 %v3008_v11  ;;  %1332 = vmatprep.subr.bf16.mxu1 %v3011_v12 }
 0x5ef   :  { %v1077_v26 = vpop.f32.mrf.mxu0  ;;  %v1118_v27 = vpop.f32.mrf.mxu1 }
 0x5f0   :  { %v1129_v28 = vrot.slane %v1077_v26, 3  ;;  %v1131_v61 = vrot.slane %v1118_v27, 3  ;;  %v1155_v26 = vrot.slane %v3019_v8, 7 }
 0x5f1   :  { %v1079_v29 = vpop.f32.mrf.mxu0  ;;  %v1120_v30 = vpop.f32.mrf.mxu1 }
 0x5f2   :  { %v1137_v31 = vadd.f32 %v1129_v28, %v2816_v55  ;;  %v1130_v32 = vrot.slane %v1079_v29, 3  ;;  %v1132_v37 = vrot.slane %v1120_v30, 3  ;;  %v1139_v7 = vadd.f32 %v1131_v61, %v2825_v45 }
 0x5f3   :  { %v1081_v33 = vpop.f32.mrf.mxu0  ;;  %v1122_v34 = vpop.f32.mrf.mxu1 }
 0x5f4   :  { %v1141_v35 = vmul.f32 0.5, %v1137_v31  ;;  %v1138_v36 = vadd.f32 %v1130_v32, %v2818_v58  ;;  %v1140_v12 = vadd.f32 %v1132_v37, %v2822_v5  ;;  %v1143_v40 = vmul.f32 0.5, %v1139_v7 }
 0x5f5   :  { %v1082_v38 = vpop.f32.mrf.mxu0  ;;  %v1123_v41 = vpop.f32.mrf.mxu1 }
 0x5f6   :  { %2356 = vtanh.f32 %v1141_v35  ;;  %v1142_v11 = vmul.f32 0.5, %v1138_v36 }
 0x5f8   :  { %2358 = vtanh.f32 %v1142_v11 }
 0x5f9   :  { %2360 = vtanh.f32 %v1140_v12 }
 0x5fa   :  { %2362 = vtanh.f32 %v1143_v40 }
 0x603   :  { %v2357_v62 = vpop.eup %2356 }
 0x604   :  { %v1147_v63 = vadd.f32 1.0, %v2357_v62 }
 0x605   :  { %v2359_v56 = vpop.eup %2358 }
 0x606   :  { %v1150_v2 = vmul.f32 0.5, %v1147_v63  ;;  %v1148_v3 = vadd.f32 1.0, %v2359_v56  ;;  %v2361_v28 = vpop.eup %2360  ;;  %v2220_v63 = vld [vmem:[#allocation8 + $0x74] ss:$8 sps:$4 sm:$0xff]   ;;  %v2218_v56 = vld [vmem:[#allocation8 + $0x70] ss:$8 sps:$4 sm:$0xff]  }
 0x607   :  { %v2363_v27 = vpop.eup %2362 }
 0x608   :  { %v1151_v39 = vmul.f32 0.5, %v1148_v3  ;;  %v1158_v30 = vmul.f32 %v2361_v28, %v1150_v2  ;;  %v1149_v32 = vadd.f32 1.0, %v2363_v27  ;;  %v2223_v2 = vld [vmem:[#allocation8 + $0x64] ss:$8 sps:$4 sm:$0xff]   ;;  %v2221_v3 = vld [vmem:[#allocation8 + $0x60] ss:$8 sps:$4 sm:$0xff]  }
 0x609   :  { %v2227_v28 = vld [vmem:[#allocation8 + $0x40] ss:$8 sps:$4 sm:$0xff]  }
 0x60a   :  { %v1157_v29 = vmul.f32 %v1155_v26, %v1151_v39  ;;  %v1152_v33 = vmul.f32 0.5, %v1149_v32  ;;  %v2226_v39 = vld [vmem:[#allocation8 + $0x54] ss:$8 sps:$4 sm:$0xff]   ;;  %v2224_v26 = vld [vmem:[#allocation8 + $0x50] ss:$8 sps:$4 sm:$0xff]  }
 0x60b   :  { %v2233_v27 = vld [vmem:[#allocation8 + $0x20] ss:$8 sps:$4 sm:$0xff]   ;;  %v2238_v32 = vld [vmem:[#allocation8 + $0x14] ss:$8 sps:$4 sm:$0xff]  }
 0x60c   :  { %v3120_v31 = vadd.f32 %v1158_v30, %v1157_v29  ;;  %v2229_v29 = vld [vmem:[#allocation8 + $0x44] ss:$8 sps:$4 sm:$0xff]   ;;  %v2232_v30 = vld [vmem:[#allocation8 + $0x34] ss:$8 sps:$4 sm:$0xff]  }
 0x60e   :  { %2364 = vtanh.f32 %v3120_v31 }
 0x61b   :  { %v2365_v34 = vpop.eup %2364 }
 0x61c   :  { %v1161_v35 = vmul.f32 %v2365_v34, %v1152_v33  ;;  %v2236_v33 = vld [vmem:[#allocation8 + $0x10] ss:$8 sps:$4 sm:$0xff]   ;;  %v2241_v34 = vld [vmem:[#allocation8 + $0x4] ss:$8 sps:$4 sm:$0xff]  }
 0x61e   :  { %v1162_v36 = vpack.c.bf16 %v1161_v35, %v1161_v35  ;;  %v3124_v37 = vsel %vm1418_vm5, %v3023_v6, %v1161_v35  ;;  %v2239_v35 = vld [vmem:[#allocation8] ss:$8 sps:$4 sm:$0xff]  }
 0x620   :  { %v1164_v38 = vshrl.u32 %v1162_v36, 16  ;;  %v2242_v36 = vld [vmem:[#allocation10 + $0x70] ss:$8 sps:$4 sm:$0xff]  }
 0x622   :  { %v1166_v41 = vrot.slane %v1164_v38, 2  ;;  %v2247_v38 = vld [vmem:[#allocation10 + $0x64] ss:$8 sps:$4 sm:$0xff]  }
 0x624   :  { %1201 = vmatmul.mubr.bf16.vlgmr.msra.gmra.mxu0 %v1166_v41  ;;  %1242 = vmatmul.mubr.bf16.vlgmr.msra.gmra.mxu1 %v1166_v41  ;;  %v2245_v41 = vld [vmem:[#allocation10 + $0x60] ss:$8 sps:$4 sm:$0xff]  }
 0x625   :  { %1292 = vmatpush1.bf16.msra.mxu0 %v2972_v1  ;;  %1333 = vmatpush1.bf16.msra.mxu1 %v2975_v60 }
 0x626   :  { %1293 = vmatprep.subr.bf16.mxu0 %v3027_v43  ;;  %1334 = vmatprep.subr.bf16.mxu1 %v3030_v44 }
 0x627   :  { %1323 = vmatprep.mubr.bf16.mxu0 %v2582_v0  ;;  %1364 = vmatprep.mubr.bf16.mxu1 %v2582_v0 }
 0x629   :  { %1294 = vmatpush1.bf16.msra.mxu0 %v3035_v46  ;;  %1335 = vmatpush1.bf16.msra.mxu1 %v3038_v9 }
 0x62a   :  { %1295 = vmatprep.subr.bf16.mxu0 %v3041_v57  ;;  %1336 = vmatprep.subr.bf16.mxu1 %v3044_v53 }
 0x62d   :  { %1296 = vmatpush1.bf16.msra.mxu0 %v3047_v10  ;;  %1337 = vmatpush1.bf16.msra.mxu1 %v3050_v4 }
 0x62e   :  { %1297 = vmatprep.subr.bf16.mxu0 %v3053_v47  ;;  %1338 = vmatprep.subr.bf16.mxu1 %v3056_v48 }
 0x631   :  { %1298 = vmatpush1.bf16.msra.mxu0 %v3059_v52  ;;  %1339 = vmatpush1.bf16.msra.mxu1 %v3062_v54 }
 0x632   :  { %1299 = vmatprep.subr.bf16.mxu0 %v3065_v42  ;;  %1340 = vmatprep.subr.bf16.mxu1 %v3068_v50 }
 0x635   :  { %1300 = vmatpush1.bf16.msra.mxu0 %v3071_v59  ;;  %1341 = vmatpush1.bf16.msra.mxu1 %v3074_v13 }
 0x636   :  { %1301 = vmatprep.subr.bf16.mxu0 %v3077_v14  ;;  %1342 = vmatprep.subr.bf16.mxu1 %v3080_v15 }
 0x639   :  { %1302 = vmatpush1.bf16.msra.mxu0 %v3083_v16  ;;  %1343 = vmatpush1.bf16.msra.mxu1 %v3086_v17 }
 0x63a   :  { %1303 = vmatprep.subr.bf16.mxu0 %v3089_v18  ;;  %1344 = vmatprep.subr.bf16.mxu1 %v3092_v19  ;;  %v1280_v19 = vrot.slane %v3120_v31, 7  ;;  %v2230_v31 = vld [vmem:[#allocation8 + $0x30] ss:$8 sps:$4 sm:$0xff]  }
 0x63d   :  { %1304 = vmatpush1.bf16.msra.mxu0 %v3095_v20  ;;  %1345 = vmatpush1.bf16.msra.mxu1 %v3098_v21 }
 0x63e   :  { %1305 = vmatprep.subr.bf16.mxu0 %v3101_v22  ;;  %1346 = vmatprep.subr.bf16.mxu1 %v3104_v23 }
 0x641   :  { %1306 = vmatpush1.bf16.msra.mxu0 %v3107_v24  ;;  %1347 = vmatpush1.bf16.msra.mxu1 %v3110_v25 }
 0x642   :  { %1533 = vmatprep.subr.bf16.mxu0 %v2220_v63 }
 0x6e4   :  { %v1202_v1 = vpop.f32.mrf.mxu0  ;;  %v1243_v60 = vpop.f32.mrf.mxu1 }
 0x6e5   :  { %v1254_v8 = vrot.slane %v1202_v1, 2  ;;  %v1256_v42 = vrot.slane %v1243_v60, 2  ;;  %v2250_v1 = vld [vmem:[#allocation10 + $0x54] ss:$8 sps:$4 sm:$0xff]   ;;  %v2248_v60 = vld [vmem:[#allocation10 + $0x50] ss:$8 sps:$4 sm:$0xff]  }
 0x6e6   :  { %v1204_v6 = vpop.f32.mrf.mxu0  ;;  %v1245_v43 = vpop.f32.mrf.mxu1 }
 0x6e7   :  { %v1262_v44 = vadd.f32 %v1254_v8, %v2816_v55  ;;  %v1255_v46 = vrot.slane %v1204_v6, 2  ;;  %v1257_v4 = vrot.slane %v1245_v43, 2  ;;  %v1264_v50 = vadd.f32 %v1256_v42, %v2825_v45  ;;  %v2253_v8 = vld [vmem:[#allocation10 + $0x44] ss:$8 sps:$4 sm:$0xff]   ;;  %v2251_v6 = vld [vmem:[#allocation10 + $0x40] ss:$8 sps:$4 sm:$0xff]  }
 0x6e8   :  { %v1206_v9 = vpop.f32.mrf.mxu0  ;;  %v1247_v57 = vpop.f32.mrf.mxu1  ;;  %v2256_v43 = vld [vmem:[#allocation10 + $0x34] ss:$8 sps:$4 sm:$0xff]  }
 0x6e9   :  { %v1266_v53 = vmul.f32 0.5, %v1262_v44  ;;  %v1263_v10 = vadd.f32 %v1255_v46, %v2818_v58  ;;  %v1265_v54 = vadd.f32 %v1257_v4, %v2822_v5  ;;  %v1268_v59 = vmul.f32 0.5, %v1264_v50  ;;  %v2254_v44 = vld [vmem:[#allocation10 + $0x30] ss:$8 sps:$4 sm:$0xff]   ;;  %v2259_v46 = vld [vmem:[#allocation10 + $0x24] ss:$8 sps:$4 sm:$0xff]  }
 0x6ea   :  { %v1207_v47 = vpop.f32.mrf.mxu0  ;;  %v1248_v48 = vpop.f32.mrf.mxu1  ;;  %v2257_v9 = vld [vmem:[#allocation10 + $0x20] ss:$8 sps:$4 sm:$0xff]   ;;  %v2262_v57 = vld [vmem:[#allocation10 + $0x14] ss:$8 sps:$4 sm:$0xff]   ;;  %v2272_v50 = vld [vmem:[#allocation10 + $0xd0] ss:$8 sps:$4 sm:$0xff]  }
 0x6eb   :  { %2366 = vtanh.f32 %v1266_v53  ;;  %v1267_v52 = vmul.f32 0.5, %v1263_v10  ;;  %v2260_v53 = vld [vmem:[#allocation10 + $0x10] ss:$8 sps:$4 sm:$0xff]   ;;  %v2265_v10 = vld [vmem:[#allocation10 + $0x4] ss:$8 sps:$4 sm:$0xff]  }
 0x6ec   :  { %v2263_v4 = vld [vmem:[#allocation10] ss:$8 sps:$4 sm:$0xff]   ;;  %v2268_v47 = vld [vmem:[#allocation10 + $0xf4] ss:$8 sps:$4 sm:$0xff]   ;;  %v2266_v48 = vld [vmem:[#allocation10 + $0xf0] ss:$8 sps:$4 sm:$0xff]  }
 0x6ed   :  { %2368 = vtanh.f32 %v1267_v52  ;;  %v2271_v52 = vld [vmem:[#allocation10 + $0xe4] ss:$8 sps:$4 sm:$0xff]   ;;  %v2274_v42 = vld [vmem:[#allocation10 + $0xd4] ss:$8 sps:$4 sm:$0xff]  }
 0x6ee   :  { %2370 = vtanh.f32 %v1265_v54  ;;  %v2269_v54 = vld [vmem:[#allocation10 + $0xe0] ss:$8 sps:$4 sm:$0xff]  }
 0x6ef   :  { %2372 = vtanh.f32 %v1268_v59  ;;  %v2277_v59 = vld [vmem:[#allocation10 + $0xc4] ss:$8 sps:$4 sm:$0xff]  }
 0x6f8   :  { %v2367_v13 = vpop.eup %2366 }
 0x6f9   :  { %v1272_v14 = vadd.f32 1.0, %v2367_v13  ;;  %v2275_v13 = vld [vmem:[#allocation10 + $0xc0] ss:$8 sps:$4 sm:$0xff]  }
 0x6fa   :  { %v2369_v15 = vpop.eup %2368 }
 0x6fb   :  { %v1275_v16 = vmul.f32 0.5, %v1272_v14  ;;  %v1273_v17 = vadd.f32 1.0, %v2369_v15  ;;  %v2371_v20 = vpop.eup %2370  ;;  %v2280_v14 = vld [vmem:[#allocation10 + $0xb4] ss:$8 sps:$4 sm:$0xff]   ;;  %v2278_v15 = vld [vmem:[#allocation10 + $0xb0] ss:$8 sps:$4 sm:$0xff]  }
 0x6fc   :  { %v2373_v24 = vpop.eup %2372 }
 0x6fd   :  { %v1276_v18 = vmul.f32 0.5, %v1273_v17  ;;  %v1283_v22 = vmul.f32 %v2371_v20, %v1275_v16  ;;  %v1274_v25 = vadd.f32 1.0, %v2373_v24  ;;  %v2283_v16 = vld [vmem:[#allocation10 + $0xa4] ss:$8 sps:$4 sm:$0xff]   ;;  %v2281_v17 = vld [vmem:[#allocation10 + $0xa0] ss:$8 sps:$4 sm:$0xff]  }
 0x6ff   :  { %v1282_v21 = vmul.f32 %v1280_v19, %v1276_v18  ;;  %v1277_v11 = vmul.f32 0.5, %v1274_v25 }
 0x701   :  { %v3163_v23 = vadd.f32 %v1283_v22, %v1282_v21 }
 0x703   :  { %2374 = vtanh.f32 %v3163_v23 }
 0x710   :  { %v2375_v12 = vpop.eup %2374 }
 0x711   :  { %v1286_v61 = vmul.f32 %v2375_v12, %v1277_v11 }
 0x713   :  { %v1287_v7 = vpack.c.bf16 %v1286_v61, %v1286_v61  ;;  %v3167_v40 = vsel %vm1420_vm6, %v3124_v37, %v1286_v61  ;;  %v2244_v37 = vld [vmem:[#allocation10 + $0x74] ss:$8 sps:$4 sm:$0xff]  }
 0x714   :  { %1782 = vmatprep.subr.bf16.mxu1 %v2244_v37 }
 0x715   :  { %v1289_v62 = vrot.slane %v1287_v7, 3 }
 0x717   :  { %1324 = vmatmul.mubr.bf16.vlgmr.msra.gmra.mxu0 %v1289_v62  ;;  %1365 = vmatmul.mubr.bf16.vlgmr.msra.gmra.mxu1 %v1289_v62 }
 0x718   :  { %1565 = vmatprep.mubr.bf16.mxu0 %v2582_v0  ;;  %1534 = vmatpush1.bf16.msra.mxu0 %v2218_v56  ;;  %v2235_v0 = vld [vmem:[#allocation8 + $0x24] ss:$8 sps:$4 sm:$0xff]  }
 0x719   :  { %1535 = vmatprep.subr.bf16.mxu0 %v2223_v2  ;;  %1783 = vmatpush1.bf16.msra.mxu1 %v2242_v36 }
 0x71a   :  { %1784 = vmatprep.subr.bf16.mxu1 %v2247_v38 }
 0x71c   :  { %1536 = vmatpush1.bf16.msra.mxu0 %v2221_v3 }
 0x71d   :  { %1537 = vmatprep.subr.bf16.mxu0 %v2226_v39  ;;  %1785 = vmatpush1.bf16.msra.mxu1 %v2245_v41 }
 0x71e   :  { %1786 = vmatprep.subr.bf16.mxu1 %v2250_v1 }
 0x720   :  { %1538 = vmatpush1.bf16.msra.mxu0 %v2224_v26 }
 0x721   :  { %1539 = vmatprep.subr.bf16.mxu0 %v2229_v29  ;;  %1787 = vmatpush1.bf16.msra.mxu1 %v2248_v60  ;;  %v2286_v60 = vld [vmem:[#allocation10 + $0x94] ss:$8 sps:$4 sm:$0xff]  }
 0x722   :  { %1788 = vmatprep.subr.bf16.mxu1 %v2253_v8  ;;  %v2284_v8 = vld [vmem:[#allocation10 + $0x90] ss:$8 sps:$4 sm:$0xff]  }
 0x724   :  { %1540 = vmatpush1.bf16.msra.mxu0 %v2227_v28 }
 0x725   :  { %1541 = vmatprep.subr.bf16.mxu0 %v2232_v30  ;;  %1789 = vmatpush1.bf16.msra.mxu1 %v2251_v6  ;;  %v2289_v6 = vld [vmem:[#allocation10 + $0x84] ss:$8 sps:$4 sm:$0xff]  }
 0x726   :  { %1790 = vmatprep.subr.bf16.mxu1 %v2256_v43  ;;  %v2290_v43 = vld [vmem:[#allocation11 + $0x78] sm:$0xff]  }
 0x728   :  { %1542 = vmatpush1.bf16.msra.mxu0 %v2230_v31 }
 0x729   :  { %1543 = vmatprep.subr.bf16.mxu0 %v2235_v0  ;;  %1791 = vmatpush1.bf16.msra.mxu1 %v2254_v44  ;;  %v2291_v44 = vld [vmem:[#allocation11 + $0x38] sm:$0xff]  }
 0x72a   :  { %1792 = vmatprep.subr.bf16.mxu1 %v2259_v46  ;;  %v2292_v46 = vld [vmem:[#allocation11 + $0x70] sm:$0xff]  }
 0x72c   :  { %1544 = vmatpush1.bf16.msra.mxu0 %v2233_v27  ;;  %v1403_v27 = vrot.slane %v3163_v23, 7  ;;  %v2287_v23 = vld [vmem:[#allocation10 + $0x80] ss:$8 sps:$4 sm:$0xff]  }
 0x72d   :  { %1545 = vmatprep.subr.bf16.mxu0 %v2238_v32  ;;  %1793 = vmatpush1.bf16.msra.mxu1 %v2257_v9  ;;  %v2293_v9 = vld [vmem:[#allocation11 + $0x30] sm:$0xff]  }
 0x72e   :  { %1794 = vmatprep.subr.bf16.mxu1 %v2262_v57  ;;  %v2294_v57 = vld [vmem:[#allocation11 + $0x68] sm:$0xff]  }
 0x730   :  { %1546 = vmatpush1.bf16.msra.mxu0 %v2236_v33 }
 0x731   :  { %1547 = vmatprep.subr.bf16.mxu0 %v2241_v34  ;;  %1795 = vmatpush1.bf16.msra.mxu1 %v2260_v53  ;;  %v2296_v53 = vld [vmem:[#allocation11 + $0x60] sm:$0xff]  }
 0x732   :  { %1796 = vmatprep.subr.bf16.mxu1 %v2265_v10  ;;  %v2297_v10 = vld [vmem:[#allocation11 + $0x20] sm:$0xff]  }
 0x734   :  { %1548 = vmatpush1.bf16.msra.mxu0 %v2239_v35 }
 0x735   :  { %1797 = vmatpush1.bf16.msra.mxu1 %v2263_v4  ;;  %2128 = vmatprep.subr.bf16.mxu0 %v2290_v43  ;;  %v2298_v4 = vld [vmem:[#allocation11 + $0x58] sm:$0xff]  }
 0x736   :  { %1798 = vmatprep.subr.bf16.mxu1 %v2268_v47  ;;  %v2299_v47 = vld [vmem:[#allocation11 + $0x18] sm:$0xff]  }
 0x739   :  { %1799 = vmatpush2.bf16.msra.mxu1 %v2266_v48  ;;  %v2300_v48 = vld [vmem:[#allocation11 + $0x50] sm:$0xff]  }
 0x73a   :  { %1800 = vmatprep.subr.bf16.mxu1 %v2271_v52  ;;  %v2301_v52 = vld [vmem:[#allocation11 + $0x10] sm:$0xff]  }
 0x73d   :  { %1801 = vmatpush2.bf16.msra.mxu1 %v2269_v54  ;;  %v1441_v54 = vld [vmem:[%s3197_s5] sm:$0x3] }
 0x73e   :  { %1802 = vmatprep.subr.bf16.mxu1 %v2274_v42  ;;  %v1446_v42 = vrot.slane %v1441_v54, %v2807_v49 }
 0x741   :  { %1803 = vmatpush2.bf16.msra.mxu1 %v2272_v50  ;;  %v1450_v50 = vrot.slane %v1441_v54, %v2812_v51 }
 0x742   :  { %1804 = vmatprep.subr.bf16.mxu1 %v2277_v59 }
 0x745   :  { %1805 = vmatpush2.bf16.msra.mxu1 %v2275_v13 }
 0x746   :  { %1806 = vmatprep.subr.bf16.mxu1 %v2280_v14 }
 0x749   :  { %1807 = vmatpush2.bf16.msra.mxu1 %v2278_v15 }
 0x74a   :  { %1808 = vmatprep.subr.bf16.mxu1 %v2283_v16 }
 0x74d   :  { %1809 = vmatpush2.bf16.msra.mxu1 %v2281_v17 }
 0x74e   :  { %1810 = vmatprep.subr.bf16.mxu1 %v2286_v60 }
 0x751   :  { %1811 = vmatpush2.bf16.msra.mxu1 %v2284_v8 }
 0x752   :  { %1812 = vmatprep.subr.bf16.mxu1 %v2289_v6 }
 0x755   :  { %1813 = vmatpush2.bf16.msra.mxu1 %v2287_v23 }
 0x7d7   :  { %v1325_v18 = vpop.f32.mrf.mxu0  ;;  %v1366_v19 = vpop.f32.mrf.mxu1 }
 0x7d8   :  { %v1377_v20 = vrot.slane %v1325_v18, 1  ;;  %v1379_v39 = vrot.slane %v1366_v19, 1 }
 0x7d9   :  { %v1327_v21 = vpop.f32.mrf.mxu0  ;;  %v1368_v22 = vpop.f32.mrf.mxu1 }
 0x7da   :  { %v1385_v24 = vadd.f32 %v1377_v20, %v2816_v55  ;;  %v1378_v25 = vrot.slane %v1327_v21, 1  ;;  %v1380_v62 = vrot.slane %v1368_v22, 1  ;;  %v1387_v26 = vadd.f32 %v1379_v39, %v2825_v45  ;;  %v2302_v22 = vld [vmem:[#allocation11 + $0x48] sm:$0xff]  }
 0x7db   :  { %v1329_v11 = vpop.f32.mrf.mxu0  ;;  %v1370_v12 = vpop.f32.mrf.mxu1 }
 0x7dc   :  { %v1389_v61 = vmul.f32 0.5, %v1385_v24  ;;  %v1386_v7 = vadd.f32 %v1378_v25, %v2818_v58  ;;  %v1388_v3 = vadd.f32 %v1380_v62, %v2822_v5  ;;  %v1391_v28 = vmul.f32 0.5, %v1387_v26  ;;  %v2303_v24 = vld [vmem:[#allocation11 + $0x8] sm:$0xff]   ;;  %v2304_v25 = vld [vmem:[#allocation11 + $0x40] sm:$0xff]   ;;  %v1610_v12 = vld [vmem:[%s3199_s7] sm:$0x3] }
 0x7dd   :  { %v1330_v63 = vpop.f32.mrf.mxu0  ;;  %v1371_v56 = vpop.f32.mrf.mxu1  ;;  %v2305_v11 = vld [vmem:[#allocation11] sm:$0xff]   ;;  %s2583_s7 = smov [#allocation13]  }
 0x7de   :  { %2376 = vtanh.f32 %v1389_v61  ;;  %v1390_v2 = vmul.f32 0.5, %v1386_v7  ;;  %v1615_v61 = vrot.slane %v1610_v12, %v2807_v49  ;;  %v1619_v7 = vrot.slane %v1610_v12, %v2812_v51  ;;  %s2013_s28 = sshll.u32 %s2583_s7, 4  ;;  %s2014_s28 = int_to_ptr.vmem [resolvable:$true] %s2013_s28 }
 0x7df   :  { %s2540_s29 = scalar_lea.vmem %s2014_s28, 128  ;;  %p2545_p3 = scmp.lt.s32.totalorder %s2014_s28, %s2014_s28 }
 0x7e0   :  { %2378 = vtanh.f32 %v1390_v2  ;;  %p2541_p2 = scmp.ne.s32.totalorder %s2014_s28, %s2540_s29  ;;  %p2546_p4 = scmp.lt.s32.totalorder %s2540_s29, %s2540_s29 }
 0x7e1   :  { %2380 = vtanh.f32 %v1388_v3 }
 0x7e2   :  { %2382 = vtanh.f32 %v1391_v28  ;;  %p2547_p5 = por %p2546_p4, %p2545_p3 }
 0x7e4   :  { %p2548_p6 = pnand %p2547_p5, %p2541_p2 }
 0x7eb   :  { %v2377_v55 = vpop.eup %2376 }
 0x7ec   :  { %v1395_v29 = vadd.f32 1.0, %v2377_v55 }
 0x7ed   :  { %v2379_v30 = vpop.eup %2378 }
 0x7ee   :  { %v1398_v31 = vmul.f32 0.5, %v1395_v29  ;;  %v1396_v0 = vadd.f32 1.0, %v2379_v30  ;;  %v2381_v32 = vpop.eup %2380 }
 0x7ef   :  { %v2383_v5 = vpop.eup %2382 }
 0x7f0   :  { %v1399_v58 = vmul.f32 0.5, %v1396_v0  ;;  %v1406_v34 = vmul.f32 %v2381_v32, %v1398_v31  ;;  %v1397_v36 = vadd.f32 1.0, %v2383_v5  ;;  %v2111_v31 = vld [vmem:[%s3201_s9] ss:$0 sm:$0xff] }
 0x7f2   :  { %v1405_v33 = vmul.f32 %v1403_v27, %v1399_v58  ;;  %v1400_v37 = vmul.f32 0.5, %v1397_v36 }
 0x7f4   :  { %v1407_v35 = vadd.f32 %v1406_v34, %v1405_v33 }
 0x7f6   :  { %2384 = vtanh.f32 %v1407_v35 }
 0x803   :  { %v2385_v38 = vpop.eup %2384 }
 0x804   :  { %v1409_v45 = vmul.f32 %v2385_v38, %v1400_v37 }
 0x806   :  { %v1423_v41 = vsel %vm1422_vm7, %v3167_v40, %v1409_v45  ;;  %v2295_v40 = vld [vmem:[#allocation11 + $0x28] sm:$0xff]  }
 0x807   :  { %v1424_v1 = vpack.c.bf16 %v1423_v41, %v1423_v41 }
 0x809   :  { %1566 = vmatmul.mubr.bf16.vlgmr.msra.gmra.mxu0 %v1424_v1 }
 0x80a   :  { %2129 = vmatpush3.bf16.msra.mxu0 %v2291_v44 }
 0x80b   :  { %2130 = vmatprep.subr.bf16.mxu0 %v2292_v46 }
 0x80e   :  { %2131 = vmatpush3.bf16.msra.mxu0 %v2293_v9 }
 0x80f   :  { %2132 = vmatprep.subr.bf16.mxu0 %v2294_v57 }
 0x812   :  { %2133 = vmatpush3.bf16.msra.mxu0 %v2295_v40 }
 0x813   :  { %2134 = vmatprep.subr.bf16.mxu0 %v2296_v53 }
 0x816   :  { %2135 = vmatpush3.bf16.msra.mxu0 %v2297_v10 }
 0x817   :  { %2136 = vmatprep.subr.bf16.mxu0 %v2298_v4 }
 0x81a   :  { %2137 = vmatpush3.bf16.msra.mxu0 %v2299_v47 }
 0x81b   :  { %2138 = vmatprep.subr.bf16.mxu0 %v2300_v48 }
 0x81e   :  { %2139 = vmatpush3.bf16.msra.mxu0 %v2301_v52 }
 0x81f   :  { %2140 = vmatprep.subr.bf16.mxu0 %v2302_v22 }
 0x822   :  { %2141 = vmatpush3.bf16.msra.mxu0 %v2303_v24 }
 0x823   :  { %2142 = vmatprep.subr.bf16.mxu0 %v2304_v25 }
 0x826   :  { %2143 = vmatpush3.bf16.msra.mxu0 %v2305_v11 }
 0x8c9   :  { %v1567_v59 = vpop.f32.mrf.mxu0 }
 0x8ca   :  { %v1568_v13 = vadd.f32 %v1567_v59, %v1446_v42 }
 0x8cb   :  { %v1569_v14 = vpop.f32.mrf.mxu0 }
 0x8cc   :  { %v1570_v15 = vadd.f32 %v1569_v14, %v1450_v50  ;;  %v1574_v16 = vmax.f32 %v1568_v13, 0.0 }
 0x8cd   :  { %v1571_v17 = vpop.f32.mrf.mxu0 }
 0x8ce   :  { %v1575_v18 = vmax.f32 %v1570_v15, 0.0  ;;  %v1576_v21 = vpack.c.bf16 %v1574_v16, %v1574_v16 }
 0x8cf   :  { %v1572_v19 = vpop.f32.mrf.mxu0 }
 0x8d0   :  { %v1577_v20 = vpack.c.bf16 %v1575_v18, %v1575_v18 }
 0x8d2   :  { %1814 = vmatprep.mubr.bf16.mxu1 %v1577_v20 }
 0x8d3   :  { %1815 = vmatmul.mubr.bf16.vlgmr.msra.gmra.mxu1 %v1576_v21 }
 0x993   :  { %v1816_v62 = vpop.f32.mrf.mxu1 }
 0x994   :  { %v1817_v63 = vadd.f32 %v1816_v62, %v1615_v61 }
 0x995   :  { %v1818_v56 = vpop.f32.mrf.mxu1 }
 0x996   :  { %v1819_v2 = vadd.f32 %v1818_v56, %v1619_v7  ;;  %v1823_v3 = vmax.f32 %v1817_v63, 0.0 }
 0x997   :  { %v1820_v39 = vpop.f32.mrf.mxu1 }
 0x998   :  { %v1824_v26 = vmax.f32 %v1819_v2, 0.0  ;;  %v1825_v29 = vpack.c.bf16 %v1823_v3, %v1823_v3 }
 0x999   :  { %v1821_v28 = vpop.f32.mrf.mxu1 }
 0x99a   :  { %v1826_v55 = vpack.c.bf16 %v1824_v26, %v1824_v26 }
 0x99c   :  { %1994 = vmatprep.mubr.bf16.mxu0 %v1826_v55 }
 0x99d   :  { %1995 = vmatmul.mubr.bf16.vlgmr.msra.gmra.mxu0 %v1825_v29 }
 0xa5d   :  { %v2144_v30 = vpop.f32.mrf.mxu0 }
 0xa5f   :  { %v2145_v49 = vpop.f32.mrf.mxu0 }
 0xa60   :  { %v2146_v0 = vadd.f32 %v2145_v49, %v2144_v30 }
 0xa61   :  { %v2147_v51 = vpop.f32.mrf.mxu0 }
 0xa62   :  { %v1997_v58 = vadd.f32 %v2146_v0, %v2111_v31 }
 0xa63   :  { %v2148_v27 = vpop.f32.mrf.mxu0 }
 0xa64   :  { %v2002_v32 = vmul.f32 0.5, %v1997_v58 }
 0xa66   :  { %2386 = vtanh.f32 %v2002_v32 }
 0xa73   :  { %v2387_v33 = vpop.eup %2386 }
 0xa74   :  { %v2004_v34 = vadd.f32 1.0, %v2387_v33 }
 0xa76   :  { %v2005_v35 = vmul.f32 0.5, %v2004_v34 }
 0xa78   :  { %2006 = vst [vmem:[#allocation13] sm:$0xff] %v2005_v35 }
 0xa79   :  { %2551 = shalt.err (!%p2548_p6)
}
 0xa7a   :  { %2016 = dma.vmem_to_hbm [thread:$0]  %s2014_s28, 128, %s3202_s10, [#allocation4]  }
 0xa7b   :  { %2568 = dma.done.wait [#allocation4], 128  }
 0xa7c   :  { %2569 = vsyncadd [#allocation4], 4294967168 }
 0xa7d   :  { %2020 = vsyncpa [#allocation3], 1 }
 0xa7e   :  { %2021 = vsyncpa [#allocation6], 1 }
 0xa7f   :  { %2022 = vsyncpa [#allocation9], 1 }
 0xa80   :  { %2023 = vsyncpa [#allocation12], 1 }
 0xa81   :  { %2024 = vsyncpa [#allocation4], 1 }

</bundles_post_ra>
